<compile_context>
chip_gen: v5e
topology: v5e:2x2
jax: 0.10.0
libtpu: 0.0.40
codegen_flags: <defaults>
</compile_context>

<pallas_src>
import jax
import jax.numpy as jnp
from jax.experimental import pallas as pl
from jax.experimental.pallas import tpu as pltpu

# Explicit scoped-VMEM limit: above the v5e default (~16 MiB), comfortably
# below v7x's 64 MiB physical VMEM.
_VMEM_LIMIT = 48 * 1024 * 1024


# ---------------------------------------------------------------------------
# Kernel 1: the three fused 1x1 projections, row-tiled over pixels.
#   theta = x @ W_theta , phi = x @ W_phi , g = x @ W_g
# x is read as f32 and cast to bf16 in-kernel (cheaper than a wrapper cast,
# which would cost an extra HBM round trip).
# ---------------------------------------------------------------------------
def _proj_kernel(x_ref, wt_ref, wp_ref, wg_ref, t_ref, p_ref, g_ref):
    xb = x_ref[...].astype(jnp.bfloat16)
    t_ref[...] = jnp.dot(xb, wt_ref[...],
                         preferred_element_type=jnp.float32).astype(t_ref.dtype)
    p_ref[...] = jnp.dot(xb, wp_ref[...],
                         preferred_element_type=jnp.float32).astype(p_ref.dtype)
    g_ref[...] = jnp.dot(xb, wg_ref[...],
                         preferred_element_type=jnp.float32).astype(g_ref.dtype)


def projections(x_flat, w_theta, w_phi, w_g, *, tm=1024):
    M, C = x_flat.shape
    C8, C2 = w_theta.shape[1], w_g.shape[1]
    # Clamp the row tile to the (8-rounded) problem size; grid uses cdiv so no
    # jnp.pad copy is needed (pixel rows are independent -> ragged block safe).
    tm = min(tm, ((M + 7) // 8) * 8)

    return pl.pallas_call(
        _proj_kernel,
        out_shape=(jax.ShapeDtypeStruct((M, C8), jnp.bfloat16),
                   jax.ShapeDtypeStruct((M, C8), jnp.bfloat16),
                   jax.ShapeDtypeStruct((M, C2), jnp.bfloat16)),
        grid=(pl.cdiv(M, tm),),
        in_specs=[
            pl.BlockSpec((tm, C), lambda i: (i, 0)),
            pl.BlockSpec((C, C8), lambda i: (0, 0)),
            pl.BlockSpec((C, C8), lambda i: (0, 0)),
            pl.BlockSpec((C, C2), lambda i: (0, 0)),
        ],
        out_specs=[
            pl.BlockSpec((tm, C8), lambda i: (i, 0)),
            pl.BlockSpec((tm, C8), lambda i: (i, 0)),
            pl.BlockSpec((tm, C2), lambda i: (i, 0)),
        ],
        compiler_params=pltpu.CompilerParams(
            dimension_semantics=("parallel",),
            vmem_limit_bytes=_VMEM_LIMIT),
    )(x_flat,
      w_theta.astype(jnp.bfloat16),
      w_phi.astype(jnp.bfloat16),
      w_g.astype(jnp.bfloat16))


# ---------------------------------------------------------------------------
# Kernel 2: fused attention with pre-pooled KV.  Per (batch, query-tile):
#   s    = theta @ phi_p^T
#   p    = exp(s - rowmax)                 (unnormalized, values <= 1)
#   attn = (p @ g_p) * reciprocal(rowsum)  (deferred softmax normalization)
#   out  = gamma * (attn @ W_o) + x
# ---------------------------------------------------------------------------
def _attn_kernel(gamma_ref, theta_ref, phi_ref, g_ref, wo_ref, x_ref, o_ref):
    theta = theta_ref[0]                       # (tq,  C8)  bf16
    phi_p = phi_ref[0]                         # (Skv, C8)  bf16 (pre-pooled)
    g_p = g_ref[0]                             # (Skv, C2)  bf16 (pre-pooled)

    s = jnp.einsum("qc,kc->qk", theta, phi_p,
                   preferred_element_type=jnp.float32)       # (tq, Skv) f32
    m = jnp.max(s, axis=-1, keepdims=True)
    p = jnp.exp(s - m)                                        # unnormalized
    denom = jnp.sum(p, axis=-1, keepdims=True)                # (tq, 1)

    # Contract first, normalize after: tq*C2 multiplies + tq EUP reciprocals
    # instead of tq*Skv f32 divides.
    attn = jnp.dot(p.astype(jnp.bfloat16), g_p,
                   preferred_element_type=jnp.float32)        # (tq, C2) f32
    attn = attn * pl.reciprocal(denom, approx=True)

    o = jnp.dot(attn.astype(jnp.bfloat16), wo_ref[...],
                preferred_element_type=jnp.float32)           # (tq, C)  f32
    o_ref[0] = gamma_ref[0, 0] * o + x_ref[0]


def fused_attention(theta, phi_p, g_p, w_o, gamma, x_res, *, tq=256):
    N, S, C8 = theta.shape
    Skv, C2 = g_p.shape[1], g_p.shape[2]
    C = w_o.shape[1]

    tq = min(tq, ((S + 7) // 8) * 8)
    gamma_arr = jnp.asarray(gamma, jnp.float32).reshape(1, 1)

    return pl.pallas_call(
        _attn_kernel,
        out_shape=jax.ShapeDtypeStruct((N, S, C), jnp.float32),
        grid=(N, pl.cdiv(S, tq)),
        in_specs=[
            pl.BlockSpec(memory_space=pltpu.MemorySpace.SMEM),      # gamma
            pl.BlockSpec((1, tq, C8), lambda b, q: (b, q, 0)),      # theta
            pl.BlockSpec((1, Skv, C8), lambda b, q: (b, 0, 0)),     # pooled phi
            pl.BlockSpec((1, Skv, C2), lambda b, q: (b, 0, 0)),     # pooled g
            pl.BlockSpec((C2, C), lambda b, q: (0, 0)),             # W_o
            pl.BlockSpec((1, tq, C), lambda b, q: (b, q, 0)),       # residual x
        ],
        out_specs=pl.BlockSpec((1, tq, C), lambda b, q: (b, q, 0)),
        compiler_params=pltpu.CompilerParams(
            dimension_semantics=("parallel", "parallel"),
            vmem_limit_bytes=_VMEM_LIMIT),
    )(gamma_arr, theta, phi_p, g_p, w_o.astype(jnp.bfloat16), x_res)


# ---------------------------------------------------------------------------
# Full AttentionBlock forward (wrapper does layout plumbing only).
# ---------------------------------------------------------------------------
def attention_forward(x_nchw, params, *, tm=1024, tq=256):
    N, C, H, W = x_nchw.shape
    assert H % 2 == 0 and W % 2 == 0, "2x2 max-pool assumes even H and W"
    # TODO(synk): F.max_pool2d floors odd spatial sizes; handle odd H/W if needed.
    C8, C2 = C // 8, C // 2
    S, Skv = H * W, (H // 2) * (W // 2)

    # TODO(synk): if the surrounding model runs channels-last, these two
    # transposes (full HBM round trips each) disappear; alternatively fold the
    # input transpose into kernel 1 by blocking x_nchw as (1, C, tm) tiles.
    x_nhwc = jnp.transpose(x_nchw, (0, 2, 3, 1))
    x_flat = x_nhwc.reshape(N * S, C)

    theta, phi, g = projections(x_flat, params["w_theta"], params["w_phi"],
                                params["w_g"], tm=tm)

    def pool2x2(t, Cc):
        # 2x2 max-pool done once on the narrow bf16 projection streams (cheap
        # XLA reduce); the attention kernel receives pooled KV directly.
        t = t.reshape(N, H // 2, 2, W // 2, 2, Cc)
        return jnp.max(t, axis=(2, 4)).reshape(N, Skv, Cc)

    phi_p = pool2x2(phi, C8)
    g_p = pool2x2(g, C2)

    out_flat = fused_attention(theta.reshape(N, S, C8), phi_p, g_p,
                               params["w_o"], params["gamma"],
                               x_nhwc.reshape(N, S, C), tq=tq)
    return jnp.transpose(out_flat.reshape(N, H, W, C), (0, 3, 1, 2))


# ---------------------------------------------------------------------------
# Deterministic parameter setup (synthetic; matches the module's shapes).
# ---------------------------------------------------------------------------
def init_params(key, channels):
    C8, C2 = channels // 8, channels // 2
    ks = jax.random.split(key, 4)

    def sn_weight(k, cin, cout):
        w = jax.random.normal(k, (cin, cout), jnp.float32) / jnp.sqrt(float(cin))
        sigma = jnp.linalg.norm(w, ord=2)   # exact largest singular value
        return w / sigma
    # TODO(synk): PyTorch spectral_norm uses a 1-step power-iteration estimate
    # of sigma; here weights are normalized by the exact top singular value.

    return dict(
        w_theta=sn_weight(ks[0], channels, C8),
        w_phi=sn_weight(ks[1], channels, C8),
        w_g=sn_weight(ks[2], channels, C2),
        w_o=sn_weight(ks[3], C2, channels),
        # PyTorch initializes gamma to 0.0 (output == input); use a nonzero
        # value here so the attention path is actually exercised by the check.
        gamma=jnp.float32(0.75),
    )


# ---------------------------------------------------------------------------
# Pure-JAX reference (mirrors the kernels' bf16-operand / f32-accumulation /
# deferred-normalization path so the comparison is tight; graph matches the
# PyTorch module).
# ---------------------------------------------------------------------------
def attention_reference(x_nchw, params):
    N, C, H, W = x_nchw.shape
    C8, C2 = C // 8, C // 2
    S, Skv = H * W, (H // 2) * (W // 2)

    x_nhwc = jnp.transpose(x_nchw, (0, 2, 3, 1))
    xb = x_nhwc.reshape(-1, C).astype(jnp.bfloat16)

    def proj(w):
        return jnp.dot(xb, w.astype(jnp.bfloat16),
                       preferred_element_type=jnp.float32).astype(jnp.bfloat16)

    theta = proj(params["w_theta"]).reshape(N, S, C8)
    phi = proj(params["w_phi"])
    g = proj(params["w_g"])

    def pool(t, Cc):
        t = t.reshape(N, H // 2, 2, W // 2, 2, Cc)
        return jnp.max(t, axis=(2, 4)).reshape(N, Skv, Cc)

    phi_p, g_p = pool(phi, C8), pool(g, C2)

    s = jnp.einsum("nqc,nkc->nqk", theta, phi_p,
                   preferred_element_type=jnp.float32)
    m = jnp.max(s, axis=-1, keepdims=True)
    p = jnp.exp(s - m)
    denom = jnp.sum(p, axis=-1, keepdims=True)

    attn = jnp.einsum("nqk,nkc->nqc", p.astype(jnp.bfloat16), g_p,
                      preferred_element_type=jnp.float32) / denom
    o = jnp.dot(attn.astype(jnp.bfloat16), params["w_o"].astype(jnp.bfloat16),
                preferred_element_type=jnp.float32)
    out = params["gamma"] * o + x_nhwc.reshape(N, S, C)
    return jnp.transpose(out.reshape(N, H, W, C), (0, 3, 1, 2))


if __name__ == "__main__":
    channels = 64            # must be a multiple of 8 for channels // 8
    N, H, W = 2, 16, 16

    key = jax.random.PRNGKey(0)
    kx, kp = jax.random.split(key)
    x = jax.random.normal(kx, (N, channels, H, W), jnp.float32)
    params = init_params(kp, channels)

    out = jax.block_until_ready(attention_forward(x, params))
    ref = jax.block_until_ready(attention_reference(x, params))

    assert out.shape == (N, channels, H, W)
    err = float(jnp.max(jnp.abs(out - ref)))
    # bf16 MXU operands + EUP approximate reciprocal bound the kernel/ref gap.
    assert err < 1e-2, err
    print("KERNEL_OK")
</pallas_src>

<mosaic_0001>
module attributes {stable_mosaic.version = 11 : i64} {
  func.func @_proj_kernel(%arg0: i32, %arg1: memref<512x64xf32, #tpu.memory_space<vmem>>, %arg2: memref<64x8xbf16, #tpu.memory_space<vmem>>, %arg3: memref<64x8xbf16, #tpu.memory_space<vmem>>, %arg4: memref<64x32xbf16, #tpu.memory_space<vmem>>, %arg5: memref<512x8xbf16, #tpu.memory_space<vmem>>, %arg6: memref<512x8xbf16, #tpu.memory_space<vmem>>, %arg7: memref<512x32xbf16, #tpu.memory_space<vmem>>) attributes {dimension_semantics = [#tpu.dimension_semantics<parallel>], iteration_bounds = array<i64: 1>, scalar_prefetch = 0 : i64, scratch_operands = 0 : i64, tpu.core_type = #tpu.core_type<tc>, window_params = [{transform_indices = @transform_0, window_bounds = array<i64: 512, 64>}, {pipeline_mode = #tpu.pipeline_mode<synchronous>, transform_indices = @transform_1, window_bounds = array<i64: 64, 8>}, {pipeline_mode = #tpu.pipeline_mode<synchronous>, transform_indices = @transform_2, window_bounds = array<i64: 64, 8>}, {pipeline_mode = #tpu.pipeline_mode<synchronous>, transform_indices = @transform_3, window_bounds = array<i64: 64, 32>}, {transform_indices = @transform_4, window_bounds = array<i64: 512, 8>}, {transform_indices = @transform_5, window_bounds = array<i64: 512, 8>}, {transform_indices = @transform_6, window_bounds = array<i64: 512, 32>}]} {
    %c0 = arith.constant 0 : index
    %c0_0 = arith.constant 0 : index
    %0 = vector.load %arg1[%c0, %c0_0] : memref<512x64xf32, #tpu.memory_space<vmem>>, vector<512x64xf32>
    %1 = arith.truncf %0 : vector<512x64xf32> to vector<512x64xbf16>
    %c0_1 = arith.constant 0 : index
    %c0_2 = arith.constant 0 : index
    %2 = vector.load %arg2[%c0_1, %c0_2] : memref<64x8xbf16, #tpu.memory_space<vmem>>, vector<64x8xbf16>
    %cst = arith.constant dense<0.000000e+00> : vector<512x8xf32>
    %3 = tpu.matmul %1, %2, %cst {dimension_numbers = #tpu.dot_dimension_numbers<[1], [0], [0], [1], [0, 0, 1, 1], [], []>} : vector<512x64xbf16>, vector<64x8xbf16>, vector<512x8xf32> -> vector<512x8xf32>
    %4 = arith.truncf %3 : vector<512x8xf32> to vector<512x8xbf16>
    %c0_3 = arith.constant 0 : index
    %c0_4 = arith.constant 0 : index
    %5 = vector.load %arg5[%c0_3, %c0_4] : memref<512x8xbf16, #tpu.memory_space<vmem>>, vector<512x8xbf16>
    tpu.vector_store %arg5[%c0_3, %c0_4], %4 {strides = array<i32>} : memref<512x8xbf16, #tpu.memory_space<vmem>>, vector<512x8xbf16>,
    %c0_5 = arith.constant 0 : index
    %c0_6 = arith.constant 0 : index
    %6 = vector.load %arg3[%c0_5, %c0_6] : memref<64x8xbf16, #tpu.memory_space<vmem>>, vector<64x8xbf16>
    %cst_7 = arith.constant dense<0.000000e+00> : vector<512x8xf32>
    %7 = tpu.matmul %1, %6, %cst_7 {dimension_numbers = #tpu.dot_dimension_numbers<[1], [0], [0], [1], [0, 0, 1, 1], [], []>} : vector<512x64xbf16>, vector<64x8xbf16>, vector<512x8xf32> -> vector<512x8xf32>
    %8 = arith.truncf %7 : vector<512x8xf32> to vector<512x8xbf16>
    %c0_8 = arith.constant 0 : index
    %c0_9 = arith.constant 0 : index
    %9 = vector.load %arg6[%c0_8, %c0_9] : memref<512x8xbf16, #tpu.memory_space<vmem>>, vector<512x8xbf16>
    tpu.vector_store %arg6[%c0_8, %c0_9], %8 {strides = array<i32>} : memref<512x8xbf16, #tpu.memory_space<vmem>>, vector<512x8xbf16>,
    %c0_10 = arith.constant 0 : index
    %c0_11 = arith.constant 0 : index
    %10 = vector.load %arg4[%c0_10, %c0_11] : memref<64x32xbf16, #tpu.memory_space<vmem>>, vector<64x32xbf16>
    %cst_12 = arith.constant dense<0.000000e+00> : vector<512x32xf32>
    %11 = tpu.matmul %1, %10, %cst_12 {dimension_numbers = #tpu.dot_dimension_numbers<[1], [0], [0], [1], [0, 0, 1, 1], [], []>} : vector<512x64xbf16>, vector<64x32xbf16>, vector<512x32xf32> -> vector<512x32xf32>
    %12 = arith.truncf %11 : vector<512x32xf32> to vector<512x32xbf16>
    %c0_13 = arith.constant 0 : index
    %c0_14 = arith.constant 0 : index
    %13 = vector.load %arg7[%c0_13, %c0_14] : memref<512x32xbf16, #tpu.memory_space<vmem>>, vector<512x32xbf16>
    tpu.vector_store %arg7[%c0_13, %c0_14], %12 {strides = array<i32>} : memref<512x32xbf16, #tpu.memory_space<vmem>>, vector<512x32xbf16>,
    return
  }
  func.func @transform_0(%arg0: i32) -> (i32, i32) {
    %c0_i32 = arith.constant 0 : i32
    %c0_i32_0 = arith.constant 0 : i32
    return %arg0, %c0_i32 : i32, i32
  }
  func.func @transform_1(%arg0: i32) -> (i32, i32) {
    %c0_i32 = arith.constant 0 : i32
    %c0_i32_0 = arith.constant 0 : i32
    %c0_i32_1 = arith.constant 0 : i32
    return %c0_i32, %c0_i32_0 : i32, i32
  }
  func.func @transform_2(%arg0: i32) -> (i32, i32) {
    %c0_i32 = arith.constant 0 : i32
    %c0_i32_0 = arith.constant 0 : i32
    %c0_i32_1 = arith.constant 0 : i32
    return %c0_i32, %c0_i32_0 : i32, i32
  }
  func.func @transform_3(%arg0: i32) -> (i32, i32) {
    %c0_i32 = arith.constant 0 : i32
    %c0_i32_0 = arith.constant 0 : i32
    %c0_i32_1 = arith.constant 0 : i32
    return %c0_i32, %c0_i32_0 : i32, i32
  }
  func.func @transform_4(%arg0: i32) -> (i32, i32) {
    %c0_i32 = arith.constant 0 : i32
    %c0_i32_0 = arith.constant 0 : i32
    return %arg0, %c0_i32 : i32, i32
  }
  func.func @transform_5(%arg0: i32) -> (i32, i32) {
    %c0_i32 = arith.constant 0 : i32
    %c0_i32_0 = arith.constant 0 : i32
    return %arg0, %c0_i32 : i32, i32
  }
  func.func @transform_6(%arg0: i32) -> (i32, i32) {
    %c0_i32 = arith.constant 0 : i32
    %c0_i32_0 = arith.constant 0 : i32
    return %arg0, %c0_i32 : i32, i32
  }
}

</mosaic_0001>

<bundles_post_ra>
// kernel: tpu_custom_call.1
= control target key start
LH: loop header
LB: loop body
LE: loop exit
PB: predicated region body
PF: predicated region fallthrough
CT: control target
= control target key end

     0   :  { %vm149_vm0 = vcmask 523264   ;;  %vm479_vm1 = vcmask 60416   ;;  %vm1138_vm2 = vcmask 257024   ;;  %s2550_s1 = inlined_call_operand.vmem [shape: bf16[64,8], index: 1, kind: input, shape index: {}]   ;;  %s2551_s2 = inlined_call_operand.vmem [shape: bf16[64,8], index: 2, kind: input, shape index: {}]   ;;  %s2552_s3 = inlined_call_operand.vmem [shape: bf16[64,32], index: 3, kind: input, shape index: {}]   ;;  %s2553_s0 = inlined_call_operand.vmem [shape: f32[512,64], index: 0, kind: input, shape index: {}]   ;;  %s2554_s4 = inlined_call_operand.vmem [shape: bf16[512,8], index: 4, kind: output, shape index: {0}]   ;;  %s2555_s5 = inlined_call_operand.vmem [shape: bf16[512,8], index: 5, kind: output, shape index: {1}]   ;;  %s2556_s6 = inlined_call_operand.vmem [shape: bf16[512,32], index: 6, kind: output, shape index: {2}]  }
   0x1   :  { %v1362_v0 = vld [vmem:[%s2550_s1 + $0x18] sm:$0xff]  ;;  %v1361_v3 = vld [vmem:[%s2550_s1 + $0x10] sm:$0xff]  ;;  %v1360_v6 = vld [vmem:[%s2550_s1 + $0x8] sm:$0xff] }
   0x2   :  { %v1366_v1 = vld [vmem:[%s2551_s2 + $0x18] sm:$0xff]  ;;  %250 = vmatpush.bf16.msra.mxu0 %v1362_v0  ;;  %1371 = vmatpush.bf16.msra.mxu3 %v1362_v0  ;;  %v1365_v4 = vld [vmem:[%s2551_s2 + $0x10] sm:$0xff]  ;;  %v1364_v7 = vld [vmem:[%s2551_s2 + $0x8] sm:$0xff] }
   0x3   :  { %v1370_v2 = vld [vmem:[%s2552_s3 + $0x18] sm:$0xff]  ;;  %580 = vmatpush.bf16.msra.mxu1 %v1366_v1  ;;  %v1369_v5 = vld [vmem:[%s2552_s3 + $0x10] sm:$0xff]  ;;  %v1368_v8 = vld [vmem:[%s2552_s3 + $0x8] sm:$0xff] }
   0x4   :  { %909 = vmatpush.bf16.msra.mxu2 %v1370_v2  ;;  %v1359_v9 = vld [vmem:[%s2550_s1] sm:$0xff]  ;;  %v22_v11 = vld [vmem:[%s2553_s0 + $0x8] sm:$0xff]  ;;  %v23_v18 = vld [vmem:[%s2553_s0 + $0x10] sm:$0xff] }
   0x5   :  { %v21_v10 = vld [vmem:[%s2553_s0] sm:$0xff]  ;;  %v70_v13 = vld [vmem:[%s2553_s0 + $0x188] sm:$0xff]  ;;  %v24_v19 = vld [vmem:[%s2553_s0 + $0x18] sm:$0xff] }
   0x6   :  { %251 = vmatpush.bf16.msra.mxu0 %v1361_v3  ;;  %1372 = vmatpush.bf16.msra.mxu3 %v1361_v3  ;;  %v69_v12 = vld [vmem:[%s2553_s0 + $0x180] sm:$0xff]  ;;  %v85_v16 = vpack.c.bf16 %v22_v11, %v21_v10  ;;  %v71_v20 = vld [vmem:[%s2553_s0 + $0x190] sm:$0xff]  ;;  %v72_v21 = vld [vmem:[%s2553_s0 + $0x198] sm:$0xff]  ;;  %v86_v22 = vpack.c.bf16 %v24_v19, %v23_v18 }
   0x7   :  { %581 = vmatpush.bf16.msra.mxu1 %v1365_v4  ;;  %v1363_v14 = vld [vmem:[%s2551_s2] sm:$0xff]  ;;  %v1466_v17 = vpack.c.bf16 %v70_v13, %v69_v12  ;;  %v1485_v23 = vpack.c.bf16 %v72_v21, %v71_v20  ;;  %v26_v25 = vld [vmem:[%s2553_s0 + $0x28] sm:$0xff]  ;;  %v27_v30 = vld [vmem:[%s2553_s0 + $0x30] sm:$0xff] }
   0x8   :  { %910 = vmatpush.bf16.msra.mxu2 %v1369_v5  ;;  %v1367_v15 = vld [vmem:[%s2552_s3] sm:$0xff]  ;;  %v74_v27 = vld [vmem:[%s2553_s0 + $0x1a8] sm:$0xff]  ;;  %v28_v31 = vld [vmem:[%s2553_s0 + $0x38] sm:$0xff] }
   0x9   :  { %v25_v24 = vld [vmem:[%s2553_s0 + $0x20] sm:$0xff]  ;;  %v75_v32 = vld [vmem:[%s2553_s0 + $0x1b0] sm:$0xff]  ;;  %v76_v33 = vld [vmem:[%s2553_s0 + $0x1b8] sm:$0xff]  ;;  %v88_v34 = vpack.c.bf16 %v28_v31, %v27_v30 }
   0xa   :  { %252 = vmatpush.bf16.msra.mxu0 %v1360_v6  ;;  %1373 = vmatpush.bf16.msra.mxu3 %v1360_v6  ;;  %v73_v26 = vld [vmem:[%s2553_s0 + $0x1a0] sm:$0xff]  ;;  %v87_v28 = vpack.c.bf16 %v26_v25, %v25_v24  ;;  %v1523_v35 = vpack.c.bf16 %v76_v33, %v75_v32  ;;  %v30_v37 = vld [vmem:[%s2553_s0 + $0x48] sm:$0xff]  ;;  %v31_v42 = vld [vmem:[%s2553_s0 + $0x50] sm:$0xff] }
   0xb   :  { %582 = vmatpush.bf16.msra.mxu1 %v1364_v7  ;;  %v1504_v29 = vpack.c.bf16 %v74_v27, %v73_v26  ;;  %v29_v36 = vld [vmem:[%s2553_s0 + $0x40] sm:$0xff]  ;;  %v78_v39 = vld [vmem:[%s2553_s0 + $0x1c8] sm:$0xff]  ;;  %v32_v43 = vld [vmem:[%s2553_s0 + $0x58] sm:$0xff] }
   0xc   :  { %911 = vmatpush.bf16.msra.mxu2 %v1368_v8  ;;  %v77_v38 = vld [vmem:[%s2553_s0 + $0x1c0] sm:$0xff]  ;;  %v89_v40 = vpack.c.bf16 %v30_v37, %v29_v36  ;;  %v79_v44 = vld [vmem:[%s2553_s0 + $0x1d0] sm:$0xff]  ;;  %v80_v45 = vld [vmem:[%s2553_s0 + $0x1d8] sm:$0xff]  ;;  %v90_v46 = vpack.c.bf16 %v32_v43, %v31_v42 }
   0xd   :  { %v1542_v41 = vpack.c.bf16 %v78_v39, %v77_v38  ;;  %v1561_v47 = vpack.c.bf16 %v80_v45, %v79_v44  ;;  %v33_v48 = vld [vmem:[%s2553_s0 + $0x60] sm:$0xff]  ;;  %v34_v49 = vld [vmem:[%s2553_s0 + $0x68] sm:$0xff]  ;;  %v35_v54 = vld [vmem:[%s2553_s0 + $0x70] sm:$0xff] }
   0xe   :  { %253 = vmatpush.bf16.msra.mxu0 %v1359_v9  ;;  %1374 = vmatpush.bf16.msra.mxu3 %v1359_v9  ;;  %v81_v50 = vld [vmem:[%s2553_s0 + $0x1e0] sm:$0xff]  ;;  %v82_v51 = vld [vmem:[%s2553_s0 + $0x1e8] sm:$0xff]  ;;  %v91_v52 = vpack.c.bf16 %v34_v49, %v33_v48  ;;  %v36_v55 = vld [vmem:[%s2553_s0 + $0x78] sm:$0xff] }
   0xf   :  { %583 = vmatpush.bf16.msra.mxu1 %v1363_v14  ;;  %v1580_v53 = vpack.c.bf16 %v82_v51, %v81_v50  ;;  %v83_v56 = vld [vmem:[%s2553_s0 + $0x1f0] sm:$0xff]  ;;  %v84_v57 = vld [vmem:[%s2553_s0 + $0x1f8] sm:$0xff]  ;;  %v92_v58 = vpack.c.bf16 %v36_v55, %v35_v54  ;;  %v37_v60 = vld [vmem:[%s2553_s0 + $0x80] sm:$0xff] }
  0x10   :  { %912 = vmatpush.bf16.msra.mxu2 %v1367_v15  ;;  %v1599_v59 = vpack.c.bf16 %v84_v57, %v83_v56  ;;  %v38_v61 = vld [vmem:[%s2553_s0 + $0x88] sm:$0xff]  ;;  %v39_v11 = vld [vmem:[%s2553_s0 + $0x90] sm:$0xff]  ;;  %v40_v12 = vld [vmem:[%s2553_s0 + $0x98] sm:$0xff] }
  0x11   :  { %1231 = vmatmul.msk.bf16.vlgmr.msra.gmra.mxu0 %vm149_vm0, %v85_v16  ;;  %1255 = vmatmul.msk.bf16.vlgmr.msra.gmra.mxu3 %vm149_vm0, %v1466_v17  ;;  %v93_v62 = vpack.c.bf16 %v38_v61, %v37_v60  ;;  %v41_v33 = vld [vmem:[%s2553_s0 + $0xa0] sm:$0xff]  ;;  %v43_v56 = vld [vmem:[%s2553_s0 + $0xb0] sm:$0xff]  ;;  %v44_v57 = vld [vmem:[%s2553_s0 + $0xb8] sm:$0xff] }
  0x12   :  { %1375 = vmatpush.bf16.msrb.mxu3 %v1366_v1  ;;  %1279 = vmatmul.msk.bf16.vlgmr.msra.gmra.mxu1 %vm149_vm0, %v85_v16 }
  0x13   :  { %1327 = vmatmul.msk.bf16.vlgmr.msra.gmra.mxu2 %vm149_vm0, %v85_v16  ;;  %v94_v16 = vpack.c.bf16 %v40_v12, %v39_v11  ;;  %v45_v12 = vld [vmem:[%s2553_s0 + $0xc0] sm:$0xff] }
  0x16   :  { %1376 = vmatpush.bf16.msrb.mxu3 %v1365_v4 }
  0x1a   :  { %1377 = vmatpush.bf16.msrb.mxu3 %v1364_v7 }
  0x1e   :  { %1378 = vmatpush.bf16.msrb.mxu3 %v1363_v14 }
  0x21   :  { %1232 = vmatmul.msk.bf16.gmra.mxu0 %vm149_vm0, %v86_v22  ;;  %1256 = vmatmul.msk.bf16.gmra.mxu3 %vm149_vm0, %v1485_v23 }
  0x22   :  { %1379 = vmatpush.bf16.msra.mxu3 %v1370_v2  ;;  %1280 = vmatmul.msk.bf16.gmra.mxu1 %vm149_vm0, %v86_v22 }
  0x23   :  { %1328 = vmatmul.msk.bf16.gmra.mxu2 %vm149_vm0, %v86_v22 }
  0x26   :  { %1380 = vmatpush.bf16.msra.mxu3 %v1369_v5 }
  0x2a   :  { %1381 = vmatpush.bf16.msra.mxu3 %v1368_v8 }
  0x2e   :  { %1382 = vmatpush.bf16.msra.mxu3 %v1367_v15 }
  0x31   :  { %1233 = vmatmul.msk.bf16.gmra.mxu0 %vm149_vm0, %v87_v28  ;;  %1257 = vmatmul.msk.bf16.gmra.mxu3 %vm149_vm0, %v1504_v29 }
  0x32   :  { %1281 = vmatmul.msk.bf16.gmra.mxu1 %vm149_vm0, %v87_v28 }
  0x33   :  { %1329 = vmatmul.msk.bf16.gmra.mxu2 %vm149_vm0, %v87_v28 }
  0x41   :  { %1234 = vmatmul.msk.bf16.gmra.mxu0 %vm149_vm0, %v88_v34  ;;  %1258 = vmatmul.msk.bf16.gmra.mxu3 %vm149_vm0, %v1523_v35 }
  0x42   :  { %1282 = vmatmul.msk.bf16.gmra.mxu1 %vm149_vm0, %v88_v34 }
  0x43   :  { %1330 = vmatmul.msk.bf16.gmra.mxu2 %vm149_vm0, %v88_v34  ;;  %v42_v34 = vld [vmem:[%s2553_s0 + $0xa8] sm:$0xff] }
  0x44   :  { %v95_v39 = vpack.c.bf16 %v42_v34, %v41_v33  ;;  %v47_v34 = vld [vmem:[%s2553_s0 + $0xd0] sm:$0xff] }
  0x51   :  { %1235 = vmatmul.msk.bf16.gmra.mxu0 %vm149_vm0, %v89_v40  ;;  %1259 = vmatmul.msk.bf16.gmra.mxu3 %vm149_vm0, %v1542_v41 }
  0x52   :  { %1283 = vmatmul.msk.bf16.gmra.mxu1 %vm149_vm0, %v89_v40 }
  0x53   :  { %1331 = vmatmul.msk.bf16.gmra.mxu2 %vm149_vm0, %v89_v40 }
  0x61   :  { %1236 = vmatmul.msk.bf16.gmra.mxu0 %vm149_vm0, %v90_v46  ;;  %1260 = vmatmul.msk.bf16.gmra.mxu3 %vm149_vm0, %v1561_v47 }
  0x62   :  { %1284 = vmatmul.msk.bf16.gmra.mxu1 %vm149_vm0, %v90_v46 }
  0x63   :  { %1332 = vmatmul.msk.bf16.gmra.mxu2 %vm149_vm0, %v90_v46 }
  0x71   :  { %1237 = vmatmul.msk.bf16.gmra.mxu0 %vm149_vm0, %v91_v52  ;;  %1261 = vmatmul.msk.bf16.gmra.mxu3 %vm149_vm0, %v1580_v53 }
  0x72   :  { %1285 = vmatmul.msk.bf16.gmra.mxu1 %vm149_vm0, %v91_v52 }
  0x73   :  { %1333 = vmatmul.msk.bf16.gmra.mxu2 %vm149_vm0, %v91_v52 }
  0x81   :  { %1238 = vmatmul.msk.bf16.gmra.mxu0 %vm149_vm0, %v92_v58  ;;  %1262 = vmatmul.msk.bf16.gmra.mxu3 %vm149_vm0, %v1599_v59 }
  0x82   :  { %1286 = vmatmul.msk.bf16.gmra.mxu1 %vm149_vm0, %v92_v58 }
  0x83   :  { %1334 = vmatmul.msk.bf16.gmra.mxu2 %vm149_vm0, %v92_v58 }
  0x8e   :  { %v255_v63 = vpop.f32.mrf.mxu0 }
  0x8f   :  { %v415_v0 = vpack.c.bf16 %v255_v63, %v255_v63  ;;  %v585_v1 = vpop.f32.mrf.mxu1 }
  0x90   :  { %v745_v2 = vpack.c.bf16 %v585_v1, %v585_v1 }
  0x91   :  { %480 = vst.msk [vmem:[%s2554_s4] sm:$0xf] %vm479_vm1, %v415_v0  ;;  %1239 = vmatmul.msk.bf16.gmra.mxu0 %vm149_vm0, %v93_v62  ;;  %1303 = vmatmul.msk.bf16.vlgmr.msrb.gmra.mxu3 %vm149_vm0, %v1466_v17 }
  0x92   :  { %809 = vst.msk [vmem:[%s2555_s5] sm:$0xf] %vm479_vm1, %v745_v2  ;;  %1287 = vmatmul.msk.bf16.gmra.mxu1 %vm149_vm0, %v93_v62 }
  0x93   :  { %1335 = vmatmul.msk.bf16.gmra.mxu2 %vm149_vm0, %v93_v62  ;;  %v96_v62 = vpack.c.bf16 %v44_v57, %v43_v56  ;;  %v49_v57 = vld [vmem:[%s2553_s0 + $0xe0] sm:$0xff] }
  0x94   :  { %v375_v3 = vpop.f32.mrf.mxu3 }
  0x95   :  { %v463_v4 = vpack.c.bf16 %v375_v3, %v375_v3 }
  0x96   :  { %v914_v5 = vpop.f32.mrf.mxu2  ;;  %v257_v7 = vpop.f32.mrf.mxu0 }
  0x97   :  { %v1074_v6 = vpack.c.bf16 %v914_v5, %v914_v5  ;;  %528 = vst.msk [vmem:[%s2554_s4 + $0xc0] sm:$0xf] %vm479_vm1, %v463_v4  ;;  %v416_v8 = vpack.c.bf16 %v257_v7, %v257_v7  ;;  %v587_v9 = vpop.f32.mrf.mxu1 }
  0x98   :  { %v746_v10 = vpack.c.bf16 %v587_v9, %v587_v9 }
  0x99   :  { %1139 = vst.msk [vmem:[%s2556_s6] sm:$0xf] %vm1138_vm2, %v1074_v6 }
  0x9a   :  { %481 = vst.msk [vmem:[%s2554_s4 + $0x4] sm:$0xf] %vm479_vm1, %v416_v8 }
  0x9b   :  { %810 = vst.msk [vmem:[%s2555_s5 + $0x4] sm:$0xf] %vm479_vm1, %v746_v10 }
  0x9c   :  { %v377_v13 = vpop.f32.mrf.mxu3 }
  0x9d   :  { %v464_v14 = vpack.c.bf16 %v377_v13, %v377_v13  ;;  %v46_v13 = vld [vmem:[%s2553_s0 + $0xc8] sm:$0xff] }
  0x9e   :  { %v916_v15 = vpop.f32.mrf.mxu2  ;;  %v260_v19 = vpop.f32.mrf.mxu0 }
  0x9f   :  { %v1075_v18 = vpack.c.bf16 %v916_v15, %v916_v15  ;;  %529 = vst.msk [vmem:[%s2554_s4 + $0xc4] sm:$0xf] %vm479_vm1, %v464_v14  ;;  %v417_v20 = vpack.c.bf16 %v260_v19, %v260_v19  ;;  %v590_v21 = vpop.f32.mrf.mxu1 }
  0xa0   :  { %v747_v22 = vpack.c.bf16 %v590_v21, %v590_v21 }
  0xa1   :  { %1140 = vst.msk [vmem:[%s2556_s6 + $0x4] sm:$0xf] %vm1138_vm2, %v1075_v18  ;;  %1240 = vmatmul.msk.bf16.gmra.mxu0 %vm149_vm0, %v94_v16  ;;  %1304 = vmatmul.msk.bf16.gmra.mxu3 %vm149_vm0, %v1485_v23  ;;  %v97_v18 = vpack.c.bf16 %v46_v13, %v45_v12  ;;  %v51_v13 = vld [vmem:[%s2553_s0 + $0xf0] sm:$0xff] }
  0xa2   :  { %482 = vst.msk [vmem:[%s2554_s4 + $0x8] sm:$0xf] %vm479_vm1, %v417_v20  ;;  %1288 = vmatmul.msk.bf16.gmra.mxu1 %vm149_vm0, %v94_v16 }
  0xa3   :  { %811 = vst.msk [vmem:[%s2555_s5 + $0x8] sm:$0xf] %vm479_vm1, %v747_v22  ;;  %1336 = vmatmul.msk.bf16.gmra.mxu2 %vm149_vm0, %v94_v16 }
  0xa4   :  { %v380_v24 = vpop.f32.mrf.mxu3 }
  0xa5   :  { %v465_v25 = vpack.c.bf16 %v380_v24, %v380_v24 }
  0xa6   :  { %v919_v26 = vpop.f32.mrf.mxu2  ;;  %v262_v28 = vpop.f32.mrf.mxu0 }
  0xa7   :  { %v1076_v27 = vpack.c.bf16 %v919_v26, %v919_v26  ;;  %530 = vst.msk [vmem:[%s2554_s4 + $0xc8] sm:$0xf] %vm479_vm1, %v465_v25  ;;  %v418_v30 = vpack.c.bf16 %v262_v28, %v262_v28  ;;  %v592_v31 = vpop.f32.mrf.mxu1 }
  0xa8   :  { %v748_v32 = vpack.c.bf16 %v592_v31, %v592_v31 }
  0xa9   :  { %1141 = vst.msk [vmem:[%s2556_s6 + $0x8] sm:$0xf] %vm1138_vm2, %v1076_v27 }
  0xaa   :  { %483 = vst.msk [vmem:[%s2554_s4 + $0xc] sm:$0xf] %vm479_vm1, %v418_v30 }
  0xab   :  { %812 = vst.msk [vmem:[%s2555_s5 + $0xc] sm:$0xf] %vm479_vm1, %v748_v32 }
  0xac   :  { %v382_v36 = vpop.f32.mrf.mxu3 }
  0xad   :  { %v466_v37 = vpack.c.bf16 %v382_v36, %v382_v36  ;;  %v48_v36 = vld [vmem:[%s2553_s0 + $0xd8] sm:$0xff] }
  0xae   :  { %v921_v38 = vpop.f32.mrf.mxu2  ;;  %v265_v42 = vpop.f32.mrf.mxu0 }
  0xaf   :  { %v1077_v40 = vpack.c.bf16 %v921_v38, %v921_v38  ;;  %531 = vst.msk [vmem:[%s2554_s4 + $0xcc] sm:$0xf] %vm479_vm1, %v466_v37  ;;  %v419_v43 = vpack.c.bf16 %v265_v42, %v265_v42  ;;  %v595_v44 = vpop.f32.mrf.mxu1 }
  0xb0   :  { %v749_v45 = vpack.c.bf16 %v595_v44, %v595_v44 }
  0xb1   :  { %1142 = vst.msk [vmem:[%s2556_s6 + $0xc] sm:$0xf] %vm1138_vm2, %v1077_v40  ;;  %1241 = vmatmul.msk.bf16.gmra.mxu0 %vm149_vm0, %v95_v39  ;;  %1305 = vmatmul.msk.bf16.gmra.mxu3 %vm149_vm0, %v1504_v29  ;;  %v98_v40 = vpack.c.bf16 %v48_v36, %v47_v34  ;;  %v53_v36 = vld [vmem:[%s2553_s0 + $0x100] sm:$0xff] }
  0xb2   :  { %484 = vst.msk [vmem:[%s2554_s4 + $0x10] sm:$0xf] %vm479_vm1, %v419_v43  ;;  %1289 = vmatmul.msk.bf16.gmra.mxu1 %vm149_vm0, %v95_v39 }
  0xb3   :  { %813 = vst.msk [vmem:[%s2555_s5 + $0x10] sm:$0xf] %vm479_vm1, %v749_v45  ;;  %1337 = vmatmul.msk.bf16.gmra.mxu2 %vm149_vm0, %v95_v39 }
  0xb4   :  { %v385_v46 = vpop.f32.mrf.mxu3 }
  0xb5   :  { %v467_v48 = vpack.c.bf16 %v385_v46, %v385_v46 }
  0xb6   :  { %v924_v49 = vpop.f32.mrf.mxu2  ;;  %v267_v51 = vpop.f32.mrf.mxu0 }
  0xb7   :  { %v1078_v50 = vpack.c.bf16 %v924_v49, %v924_v49  ;;  %532 = vst.msk [vmem:[%s2554_s4 + $0xd0] sm:$0xf] %vm479_vm1, %v467_v48  ;;  %v420_v52 = vpack.c.bf16 %v267_v51, %v267_v51  ;;  %v597_v54 = vpop.f32.mrf.mxu1 }
  0xb8   :  { %v750_v55 = vpack.c.bf16 %v597_v54, %v597_v54 }
  0xb9   :  { %1143 = vst.msk [vmem:[%s2556_s6 + $0x10] sm:$0xf] %vm1138_vm2, %v1078_v50 }
  0xba   :  { %485 = vst.msk [vmem:[%s2554_s4 + $0x14] sm:$0xf] %vm479_vm1, %v420_v52 }
  0xbb   :  { %814 = vst.msk [vmem:[%s2555_s5 + $0x14] sm:$0xf] %vm479_vm1, %v750_v55 }
  0xbc   :  { %v387_v58 = vpop.f32.mrf.mxu3 }
  0xbd   :  { %v468_v60 = vpack.c.bf16 %v387_v58, %v387_v58  ;;  %v50_v58 = vld [vmem:[%s2553_s0 + $0xe8] sm:$0xff] }
  0xbe   :  { %v926_v61 = vpop.f32.mrf.mxu2  ;;  %v270_v0 = vpop.f32.mrf.mxu0 }
  0xbf   :  { %v1079_v63 = vpack.c.bf16 %v926_v61, %v926_v61  ;;  %533 = vst.msk [vmem:[%s2554_s4 + $0xd4] sm:$0xf] %vm479_vm1, %v468_v60  ;;  %v421_v1 = vpack.c.bf16 %v270_v0, %v270_v0  ;;  %v600_v2 = vpop.f32.mrf.mxu1 }
  0xc0   :  { %v751_v3 = vpack.c.bf16 %v600_v2, %v600_v2 }
  0xc1   :  { %1144 = vst.msk [vmem:[%s2556_s6 + $0x14] sm:$0xf] %vm1138_vm2, %v1079_v63  ;;  %1242 = vmatmul.msk.bf16.gmra.mxu0 %vm149_vm0, %v96_v62  ;;  %1306 = vmatmul.msk.bf16.gmra.mxu3 %vm149_vm0, %v1523_v35  ;;  %v99_v63 = vpack.c.bf16 %v50_v58, %v49_v57  ;;  %v55_v57 = vld [vmem:[%s2553_s0 + $0x110] sm:$0xff]  ;;  %v56_v58 = vld [vmem:[%s2553_s0 + $0x118] sm:$0xff] }
  0xc2   :  { %486 = vst.msk [vmem:[%s2554_s4 + $0x18] sm:$0xf] %vm479_vm1, %v421_v1  ;;  %1290 = vmatmul.msk.bf16.gmra.mxu1 %vm149_vm0, %v96_v62 }
  0xc3   :  { %815 = vst.msk [vmem:[%s2555_s5 + $0x18] sm:$0xf] %vm479_vm1, %v751_v3  ;;  %1338 = vmatmul.msk.bf16.gmra.mxu2 %vm149_vm0, %v96_v62 }
  0xc4   :  { %v390_v4 = vpop.f32.mrf.mxu3 }
  0xc5   :  { %v469_v5 = vpack.c.bf16 %v390_v4, %v390_v4 }
  0xc6   :  { %v929_v6 = vpop.f32.mrf.mxu2  ;;  %v272_v8 = vpop.f32.mrf.mxu0 }
  0xc7   :  { %v1080_v7 = vpack.c.bf16 %v929_v6, %v929_v6  ;;  %534 = vst.msk [vmem:[%s2554_s4 + $0xd8] sm:$0xf] %vm479_vm1, %v469_v5  ;;  %v422_v9 = vpack.c.bf16 %v272_v8, %v272_v8  ;;  %v602_v10 = vpop.f32.mrf.mxu1 }
  0xc8   :  { %v752_v11 = vpack.c.bf16 %v602_v10, %v602_v10 }
  0xc9   :  { %1145 = vst.msk [vmem:[%s2556_s6 + $0x18] sm:$0xf] %vm1138_vm2, %v1080_v7 }
  0xca   :  { %487 = vst.msk [vmem:[%s2554_s4 + $0x1c] sm:$0xf] %vm479_vm1, %v422_v9 }
  0xcb   :  { %816 = vst.msk [vmem:[%s2555_s5 + $0x1c] sm:$0xf] %vm479_vm1, %v752_v11 }
  0xcc   :  { %v392_v14 = vpop.f32.mrf.mxu3 }
  0xcd   :  { %v470_v15 = vpack.c.bf16 %v392_v14, %v392_v14  ;;  %v52_v14 = vld [vmem:[%s2553_s0 + $0xf8] sm:$0xff] }
  0xce   :  { %v931_v16 = vpop.f32.mrf.mxu2  ;;  %v275_v20 = vpop.f32.mrf.mxu0 }
  0xcf   :  { %v1081_v19 = vpack.c.bf16 %v931_v16, %v931_v16  ;;  %535 = vst.msk [vmem:[%s2554_s4 + $0xdc] sm:$0xf] %vm479_vm1, %v470_v15  ;;  %v423_v21 = vpack.c.bf16 %v275_v20, %v275_v20  ;;  %v605_v22 = vpop.f32.mrf.mxu1 }
  0xd0   :  { %v753_v24 = vpack.c.bf16 %v605_v22, %v605_v22 }
  0xd1   :  { %1146 = vst.msk [vmem:[%s2556_s6 + $0x1c] sm:$0xf] %vm1138_vm2, %v1081_v19  ;;  %1243 = vmatmul.msk.bf16.gmra.mxu0 %vm149_vm0, %v97_v18  ;;  %1307 = vmatmul.msk.bf16.gmra.mxu3 %vm149_vm0, %v1542_v41  ;;  %v100_v19 = vpack.c.bf16 %v52_v14, %v51_v13  ;;  %v58_v13 = vld [vmem:[%s2553_s0 + $0x128] sm:$0xff] }
  0xd2   :  { %488 = vst.msk [vmem:[%s2554_s4 + $0x20] sm:$0xf] %vm479_vm1, %v423_v21  ;;  %1291 = vmatmul.msk.bf16.gmra.mxu1 %vm149_vm0, %v97_v18 }
  0xd3   :  { %817 = vst.msk [vmem:[%s2555_s5 + $0x20] sm:$0xf] %vm479_vm1, %v753_v24  ;;  %1339 = vmatmul.msk.bf16.gmra.mxu2 %vm149_vm0, %v97_v18 }
  0xd4   :  { %v395_v25 = vpop.f32.mrf.mxu3 }
  0xd5   :  { %v471_v26 = vpack.c.bf16 %v395_v25, %v395_v25 }
  0xd6   :  { %v934_v27 = vpop.f32.mrf.mxu2  ;;  %v277_v30 = vpop.f32.mrf.mxu0 }
  0xd7   :  { %v1082_v28 = vpack.c.bf16 %v934_v27, %v934_v27  ;;  %536 = vst.msk [vmem:[%s2554_s4 + $0xe0] sm:$0xf] %vm479_vm1, %v471_v26  ;;  %v424_v31 = vpack.c.bf16 %v277_v30, %v277_v30  ;;  %v607_v32 = vpop.f32.mrf.mxu1 }
  0xd8   :  { %v754_v33 = vpack.c.bf16 %v607_v32, %v607_v32 }
  0xd9   :  { %1147 = vst.msk [vmem:[%s2556_s6 + $0x20] sm:$0xf] %vm1138_vm2, %v1082_v28 }
  0xda   :  { %489 = vst.msk [vmem:[%s2554_s4 + $0x24] sm:$0xf] %vm479_vm1, %v424_v31 }
  0xdb   :  { %818 = vst.msk [vmem:[%s2555_s5 + $0x24] sm:$0xf] %vm479_vm1, %v754_v33 }
  0xdc   :  { %v397_v37 = vpop.f32.mrf.mxu3 }
  0xdd   :  { %v472_v38 = vpack.c.bf16 %v397_v37, %v397_v37  ;;  %v54_v37 = vld [vmem:[%s2553_s0 + $0x108] sm:$0xff] }
  0xde   :  { %v936_v39 = vpop.f32.mrf.mxu2  ;;  %v280_v43 = vpop.f32.mrf.mxu0 }
  0xdf   :  { %v1083_v42 = vpack.c.bf16 %v936_v39, %v936_v39  ;;  %537 = vst.msk [vmem:[%s2554_s4 + $0xe4] sm:$0xf] %vm479_vm1, %v472_v38  ;;  %v425_v44 = vpack.c.bf16 %v280_v43, %v280_v43  ;;  %v610_v45 = vpop.f32.mrf.mxu1 }
  0xe0   :  { %v755_v46 = vpack.c.bf16 %v610_v45, %v610_v45 }
  0xe1   :  { %1148 = vst.msk [vmem:[%s2556_s6 + $0x24] sm:$0xf] %vm1138_vm2, %v1083_v42  ;;  %1244 = vmatmul.msk.bf16.gmra.mxu0 %vm149_vm0, %v98_v40  ;;  %1308 = vmatmul.msk.bf16.gmra.mxu3 %vm149_vm0, %v1561_v47  ;;  %v101_v42 = vpack.c.bf16 %v54_v37, %v53_v36 }
  0xe2   :  { %490 = vst.msk [vmem:[%s2554_s4 + $0x28] sm:$0xf] %vm479_vm1, %v425_v44  ;;  %1292 = vmatmul.msk.bf16.gmra.mxu1 %vm149_vm0, %v98_v40 }
  0xe3   :  { %819 = vst.msk [vmem:[%s2555_s5 + $0x28] sm:$0xf] %vm479_vm1, %v755_v46  ;;  %1340 = vmatmul.msk.bf16.gmra.mxu2 %vm149_vm0, %v98_v40 }
  0xe4   :  { %v400_v48 = vpop.f32.mrf.mxu3 }
  0xe5   :  { %v473_v49 = vpack.c.bf16 %v400_v48, %v400_v48 }
  0xe6   :  { %v939_v50 = vpop.f32.mrf.mxu2  ;;  %v282_v52 = vpop.f32.mrf.mxu0 }
  0xe7   :  { %v1084_v51 = vpack.c.bf16 %v939_v50, %v939_v50  ;;  %538 = vst.msk [vmem:[%s2554_s4 + $0xe8] sm:$0xf] %vm479_vm1, %v473_v49  ;;  %v426_v54 = vpack.c.bf16 %v282_v52, %v282_v52  ;;  %v612_v55 = vpop.f32.mrf.mxu1 }
  0xe8   :  { %v756_v56 = vpack.c.bf16 %v612_v55, %v612_v55 }
  0xe9   :  { %1149 = vst.msk [vmem:[%s2556_s6 + $0x28] sm:$0xf] %vm1138_vm2, %v1084_v51 }
  0xea   :  { %491 = vst.msk [vmem:[%s2554_s4 + $0x2c] sm:$0xf] %vm479_vm1, %v426_v54 }
  0xeb   :  { %820 = vst.msk [vmem:[%s2555_s5 + $0x2c] sm:$0xf] %vm479_vm1, %v756_v56 }
  0xec   :  { %v402_v60 = vpop.f32.mrf.mxu3 }
  0xed   :  { %v474_v61 = vpack.c.bf16 %v402_v60, %v402_v60 }
  0xee   :  { %v941_v62 = vpop.f32.mrf.mxu2  ;;  %v285_v1 = vpop.f32.mrf.mxu0 }
  0xef   :  { %v1085_v0 = vpack.c.bf16 %v941_v62, %v941_v62  ;;  %539 = vst.msk [vmem:[%s2554_s4 + $0xec] sm:$0xf] %vm479_vm1, %v474_v61  ;;  %v427_v2 = vpack.c.bf16 %v285_v1, %v285_v1  ;;  %v615_v3 = vpop.f32.mrf.mxu1 }
  0xf0   :  { %v757_v4 = vpack.c.bf16 %v615_v3, %v615_v3 }
  0xf1   :  { %1150 = vst.msk [vmem:[%s2556_s6 + $0x2c] sm:$0xf] %vm1138_vm2, %v1085_v0  ;;  %1245 = vmatmul.msk.bf16.gmra.mxu0 %vm149_vm0, %v99_v63  ;;  %1309 = vmatmul.msk.bf16.gmra.mxu3 %vm149_vm0, %v1580_v53 }
  0xf2   :  { %492 = vst.msk [vmem:[%s2554_s4 + $0x30] sm:$0xf] %vm479_vm1, %v427_v2  ;;  %1293 = vmatmul.msk.bf16.gmra.mxu1 %vm149_vm0, %v99_v63 }
  0xf3   :  { %821 = vst.msk [vmem:[%s2555_s5 + $0x30] sm:$0xf] %vm479_vm1, %v757_v4  ;;  %1341 = vmatmul.msk.bf16.gmra.mxu2 %vm149_vm0, %v99_v63  ;;  %v102_v63 = vpack.c.bf16 %v56_v58, %v55_v57 }
  0xf4   :  { %v405_v5 = vpop.f32.mrf.mxu3 }
  0xf5   :  { %v475_v6 = vpack.c.bf16 %v405_v5, %v405_v5 }
  0xf6   :  { %v944_v7 = vpop.f32.mrf.mxu2  ;;  %v287_v9 = vpop.f32.mrf.mxu0 }
  0xf7   :  { %v1086_v8 = vpack.c.bf16 %v944_v7, %v944_v7  ;;  %540 = vst.msk [vmem:[%s2554_s4 + $0xf0] sm:$0xf] %vm479_vm1, %v475_v6  ;;  %v428_v10 = vpack.c.bf16 %v287_v9, %v287_v9  ;;  %v617_v11 = vpop.f32.mrf.mxu1 }
  0xf8   :  { %v758_v12 = vpack.c.bf16 %v617_v11, %v617_v11 }
  0xf9   :  { %1151 = vst.msk [vmem:[%s2556_s6 + $0x30] sm:$0xf] %vm1138_vm2, %v1086_v8 }
  0xfa   :  { %493 = vst.msk [vmem:[%s2554_s4 + $0x34] sm:$0xf] %vm479_vm1, %v428_v10 }
  0xfb   :  { %822 = vst.msk [vmem:[%s2555_s5 + $0x34] sm:$0xf] %vm479_vm1, %v758_v12  ;;  %v57_v12 = vld [vmem:[%s2553_s0 + $0x120] sm:$0xff] }
  0xfc   :  { %v407_v15 = vpop.f32.mrf.mxu3 }
  0xfd   :  { %v476_v16 = vpack.c.bf16 %v407_v15, %v407_v15 }
  0xfe   :  { %v946_v18 = vpop.f32.mrf.mxu2  ;;  %v290_v21 = vpop.f32.mrf.mxu0 }
  0xff   :  { %v1087_v20 = vpack.c.bf16 %v946_v18, %v946_v18  ;;  %541 = vst.msk [vmem:[%s2554_s4 + $0xf4] sm:$0xf] %vm479_vm1, %v476_v16  ;;  %v429_v22 = vpack.c.bf16 %v290_v21, %v290_v21  ;;  %v620_v24 = vpop.f32.mrf.mxu1  ;;  %v103_v18 = vpack.c.bf16 %v58_v13, %v57_v12 }
 0x100   :  { %v759_v25 = vpack.c.bf16 %v620_v24, %v620_v24 }
 0x101   :  { %1152 = vst.msk [vmem:[%s2556_s6 + $0x34] sm:$0xf] %vm1138_vm2, %v1087_v20  ;;  %1246 = vmatmul.msk.bf16.gmra.mxu0 %vm149_vm0, %v100_v19  ;;  %1310 = vmatmul.msk.bf16.gmra.mxu3 %vm149_vm0, %v1599_v59 }
 0x102   :  { %494 = vst.msk [vmem:[%s2554_s4 + $0x38] sm:$0xf] %vm479_vm1, %v429_v22  ;;  %1294 = vmatmul.msk.bf16.gmra.mxu1 %vm149_vm0, %v100_v19 }
 0x103   :  { %823 = vst.msk [vmem:[%s2555_s5 + $0x38] sm:$0xf] %vm479_vm1, %v759_v25  ;;  %1342 = vmatmul.msk.bf16.gmra.mxu2 %vm149_vm0, %v100_v19 }
 0x104   :  { %v410_v26 = vpop.f32.mrf.mxu3 }
 0x105   :  { %v477_v27 = vpack.c.bf16 %v410_v26, %v410_v26 }
 0x106   :  { %v949_v28 = vpop.f32.mrf.mxu2  ;;  %v292_v31 = vpop.f32.mrf.mxu0 }
 0x107   :  { %v1088_v30 = vpack.c.bf16 %v949_v28, %v949_v28  ;;  %542 = vst.msk [vmem:[%s2554_s4 + $0xf8] sm:$0xf] %vm479_vm1, %v477_v27  ;;  %v430_v32 = vpack.c.bf16 %v292_v31, %v292_v31  ;;  %v622_v33 = vpop.f32.mrf.mxu1 }
 0x108   :  { %v760_v34 = vpack.c.bf16 %v622_v33, %v622_v33  ;;  %v59_v33 = vld [vmem:[%s2553_s0 + $0x130] sm:$0xff] }
 0x109   :  { %1153 = vst.msk [vmem:[%s2556_s6 + $0x38] sm:$0xf] %vm1138_vm2, %v1088_v30 }
 0x10a   :  { %495 = vst.msk [vmem:[%s2554_s4 + $0x3c] sm:$0xf] %vm479_vm1, %v430_v32 }
 0x10b   :  { %824 = vst.msk [vmem:[%s2555_s5 + $0x3c] sm:$0xf] %vm479_vm1, %v760_v34  ;;  %v60_v34 = vld [vmem:[%s2553_s0 + $0x138] sm:$0xff] }
 0x10c   :  { %v412_v38 = vpop.f32.mrf.mxu3 }
 0x10d   :  { %v478_v39 = vpack.c.bf16 %v412_v38, %v412_v38 }
 0x10e   :  { %v951_v40 = vpop.f32.mrf.mxu2  ;;  %v295_v44 = vpop.f32.mrf.mxu0 }
 0x10f   :  { %v1089_v43 = vpack.c.bf16 %v951_v40, %v951_v40  ;;  %543 = vst.msk [vmem:[%s2554_s4 + $0xfc] sm:$0xf] %vm479_vm1, %v478_v39  ;;  %v431_v45 = vpack.c.bf16 %v295_v44, %v295_v44  ;;  %v625_v46 = vpop.f32.mrf.mxu1  ;;  %v104_v39 = vpack.c.bf16 %v60_v34, %v59_v33 }
 0x110   :  { %v761_v48 = vpack.c.bf16 %v625_v46, %v625_v46 }
 0x111   :  { %1154 = vst.msk [vmem:[%s2556_s6 + $0x3c] sm:$0xf] %vm1138_vm2, %v1089_v43  ;;  %1247 = vmatmul.msk.bf16.gmra.mxu0 %vm149_vm0, %v101_v42  ;;  %1351 = vmatmul.msk.bf16.vlgmr.msra.gmra.mxu3 %vm149_vm0, %v1466_v17 }
 0x112   :  { %496 = vst.msk [vmem:[%s2554_s4 + $0x40] sm:$0xf] %vm479_vm1, %v431_v45  ;;  %1295 = vmatmul.msk.bf16.gmra.mxu1 %vm149_vm0, %v101_v42 }
 0x113   :  { %825 = vst.msk [vmem:[%s2555_s5 + $0x40] sm:$0xf] %vm479_vm1, %v761_v48  ;;  %1343 = vmatmul.msk.bf16.gmra.mxu2 %vm149_vm0, %v101_v42 }
 0x114   :  { %v705_v49 = vpop.f32.mrf.mxu3 }
 0x115   :  { %v793_v50 = vpack.c.bf16 %v705_v49, %v705_v49 }
 0x116   :  { %v954_v51 = vpop.f32.mrf.mxu2  ;;  %v297_v54 = vpop.f32.mrf.mxu0 }
 0x117   :  { %v1090_v52 = vpack.c.bf16 %v954_v51, %v954_v51  ;;  %857 = vst.msk [vmem:[%s2555_s5 + $0xc0] sm:$0xf] %vm479_vm1, %v793_v50  ;;  %v432_v17 = vpack.c.bf16 %v297_v54, %v297_v54  ;;  %v627_v55 = vpop.f32.mrf.mxu1 }
 0x118   :  { %v762_v56 = vpack.c.bf16 %v627_v55, %v627_v55  ;;  %v62_v55 = vld [vmem:[%s2553_s0 + $0x148] sm:$0xff] }
 0x119   :  { %1155 = vst.msk [vmem:[%s2556_s6 + $0x40] sm:$0xf] %vm1138_vm2, %v1090_v52 }
 0x11a   :  { %497 = vst.msk [vmem:[%s2554_s4 + $0x44] sm:$0xf] %vm479_vm1, %v432_v17  ;;  %v61_v17 = vld [vmem:[%s2553_s0 + $0x140] sm:$0xff] }
 0x11b   :  { %826 = vst.msk [vmem:[%s2555_s5 + $0x44] sm:$0xf] %vm479_vm1, %v762_v56 }
 0x11c   :  { %v707_v60 = vpop.f32.mrf.mxu3 }
 0x11d   :  { %v794_v61 = vpack.c.bf16 %v707_v60, %v707_v60  ;;  %v105_v60 = vpack.c.bf16 %v62_v55, %v61_v17 }
 0x11e   :  { %v956_v62 = vpop.f32.mrf.mxu2  ;;  %v300_v1 = vpop.f32.mrf.mxu0 }
 0x11f   :  { %v1091_v0 = vpack.c.bf16 %v956_v62, %v956_v62  ;;  %858 = vst.msk [vmem:[%s2555_s5 + $0xc4] sm:$0xf] %vm479_vm1, %v794_v61  ;;  %v433_v2 = vpack.c.bf16 %v300_v1, %v300_v1  ;;  %v630_v3 = vpop.f32.mrf.mxu1 }
 0x120   :  { %v763_v4 = vpack.c.bf16 %v630_v3, %v630_v3 }
 0x121   :  { %1156 = vst.msk [vmem:[%s2556_s6 + $0x44] sm:$0xf] %vm1138_vm2, %v1091_v0  ;;  %1248 = vmatmul.msk.bf16.gmra.mxu0 %vm149_vm0, %v102_v63  ;;  %1352 = vmatmul.msk.bf16.gmra.mxu3 %vm149_vm0, %v1485_v23 }
 0x122   :  { %498 = vst.msk [vmem:[%s2554_s4 + $0x48] sm:$0xf] %vm479_vm1, %v433_v2  ;;  %1296 = vmatmul.msk.bf16.gmra.mxu1 %vm149_vm0, %v102_v63 }
 0x123   :  { %827 = vst.msk [vmem:[%s2555_s5 + $0x48] sm:$0xf] %vm479_vm1, %v763_v4  ;;  %1344 = vmatmul.msk.bf16.gmra.mxu2 %vm149_vm0, %v102_v63 }
 0x124   :  { %v710_v5 = vpop.f32.mrf.mxu3 }
 0x125   :  { %v795_v6 = vpack.c.bf16 %v710_v5, %v710_v5 }
 0x126   :  { %v959_v7 = vpop.f32.mrf.mxu2  ;;  %v302_v9 = vpop.f32.mrf.mxu0 }
 0x127   :  { %v1092_v8 = vpack.c.bf16 %v959_v7, %v959_v7  ;;  %859 = vst.msk [vmem:[%s2555_s5 + $0xc8] sm:$0xf] %vm479_vm1, %v795_v6  ;;  %v434_v23 = vpack.c.bf16 %v302_v9, %v302_v9  ;;  %v632_v10 = vpop.f32.mrf.mxu1  ;;  %v63_v9 = vld [vmem:[%s2553_s0 + $0x150] sm:$0xff] }
 0x128   :  { %v764_v11 = vpack.c.bf16 %v632_v10, %v632_v10 }
 0x129   :  { %1157 = vst.msk [vmem:[%s2556_s6 + $0x48] sm:$0xf] %vm1138_vm2, %v1092_v8 }
 0x12a   :  { %499 = vst.msk [vmem:[%s2554_s4 + $0x4c] sm:$0xf] %vm479_vm1, %v434_v23  ;;  %v64_v23 = vld [vmem:[%s2553_s0 + $0x158] sm:$0xff] }
 0x12b   :  { %828 = vst.msk [vmem:[%s2555_s5 + $0x4c] sm:$0xf] %vm479_vm1, %v764_v11  ;;  %v106_v13 = vpack.c.bf16 %v64_v23, %v63_v9 }
 0x12c   :  { %v712_v14 = vpop.f32.mrf.mxu3 }
 0x12d   :  { %v796_v15 = vpack.c.bf16 %v712_v14, %v712_v14 }
 0x12e   :  { %v961_v16 = vpop.f32.mrf.mxu2  ;;  %v305_v20 = vpop.f32.mrf.mxu0 }
 0x12f   :  { %v1093_v19 = vpack.c.bf16 %v961_v16, %v961_v16  ;;  %860 = vst.msk [vmem:[%s2555_s5 + $0xcc] sm:$0xf] %vm479_vm1, %v796_v15  ;;  %v435_v21 = vpack.c.bf16 %v305_v20, %v305_v20  ;;  %v635_v22 = vpop.f32.mrf.mxu1 }
 0x130   :  { %v765_v24 = vpack.c.bf16 %v635_v22, %v635_v22 }
 0x131   :  { %1158 = vst.msk [vmem:[%s2556_s6 + $0x4c] sm:$0xf] %vm1138_vm2, %v1093_v19  ;;  %1249 = vmatmul.msk.bf16.gmra.mxu0 %vm149_vm0, %v103_v18  ;;  %1353 = vmatmul.msk.bf16.gmra.mxu3 %vm149_vm0, %v1504_v29 }
 0x132   :  { %500 = vst.msk [vmem:[%s2554_s4 + $0x50] sm:$0xf] %vm479_vm1, %v435_v21  ;;  %1297 = vmatmul.msk.bf16.gmra.mxu1 %vm149_vm0, %v103_v18 }
 0x133   :  { %829 = vst.msk [vmem:[%s2555_s5 + $0x50] sm:$0xf] %vm479_vm1, %v765_v24  ;;  %1345 = vmatmul.msk.bf16.gmra.mxu2 %vm149_vm0, %v103_v18 }
 0x134   :  { %v715_v25 = vpop.f32.mrf.mxu3 }
 0x135   :  { %v797_v26 = vpack.c.bf16 %v715_v25, %v715_v25 }
 0x136   :  { %v964_v27 = vpop.f32.mrf.mxu2  ;;  %v307_v30 = vpop.f32.mrf.mxu0 }
 0x137   :  { %v1094_v28 = vpack.c.bf16 %v964_v27, %v964_v27  ;;  %861 = vst.msk [vmem:[%s2555_s5 + $0xd0] sm:$0xf] %vm479_vm1, %v797_v26  ;;  %v436_v29 = vpack.c.bf16 %v307_v30, %v307_v30  ;;  %v637_v31 = vpop.f32.mrf.mxu1  ;;  %v66_v30 = vld [vmem:[%s2553_s0 + $0x168] sm:$0xff] }
 0x138   :  { %v766_v32 = vpack.c.bf16 %v637_v31, %v637_v31 }
 0x139   :  { %1159 = vst.msk [vmem:[%s2556_s6 + $0x50] sm:$0xf] %vm1138_vm2, %v1094_v28  ;;  %v65_v28 = vld [vmem:[%s2553_s0 + $0x160] sm:$0xff] }
 0x13a   :  { %501 = vst.msk [vmem:[%s2554_s4 + $0x54] sm:$0xf] %vm479_vm1, %v436_v29  ;;  %v107_v33 = vpack.c.bf16 %v66_v30, %v65_v28 }
 0x13b   :  { %830 = vst.msk [vmem:[%s2555_s5 + $0x54] sm:$0xf] %vm479_vm1, %v766_v32 }
 0x13c   :  { %v717_v36 = vpop.f32.mrf.mxu3 }
 0x13d   :  { %v798_v37 = vpack.c.bf16 %v717_v36, %v717_v36 }
 0x13e   :  { %v966_v38 = vpop.f32.mrf.mxu2  ;;  %v310_v42 = vpop.f32.mrf.mxu0 }
 0x13f   :  { %v1095_v40 = vpack.c.bf16 %v966_v38, %v966_v38  ;;  %862 = vst.msk [vmem:[%s2555_s5 + $0xd4] sm:$0xf] %vm479_vm1, %v798_v37  ;;  %v437_v43 = vpack.c.bf16 %v310_v42, %v310_v42  ;;  %v640_v44 = vpop.f32.mrf.mxu1 }
 0x140   :  { %v767_v45 = vpack.c.bf16 %v640_v44, %v640_v44 }
 0x141   :  { %1160 = vst.msk [vmem:[%s2556_s6 + $0x54] sm:$0xf] %vm1138_vm2, %v1095_v40  ;;  %1250 = vmatmul.msk.bf16.gmra.mxu0 %vm149_vm0, %v104_v39  ;;  %1354 = vmatmul.msk.bf16.gmra.mxu3 %vm149_vm0, %v1523_v35 }
 0x142   :  { %502 = vst.msk [vmem:[%s2554_s4 + $0x58] sm:$0xf] %vm479_vm1, %v437_v43  ;;  %1298 = vmatmul.msk.bf16.gmra.mxu1 %vm149_vm0, %v104_v39 }
 0x143   :  { %831 = vst.msk [vmem:[%s2555_s5 + $0x58] sm:$0xf] %vm479_vm1, %v767_v45  ;;  %1346 = vmatmul.msk.bf16.gmra.mxu2 %vm149_vm0, %v104_v39 }
 0x144   :  { %v720_v46 = vpop.f32.mrf.mxu3 }
 0x145   :  { %v799_v48 = vpack.c.bf16 %v720_v46, %v720_v46 }
 0x146   :  { %v969_v49 = vpop.f32.mrf.mxu2  ;;  %v312_v51 = vpop.f32.mrf.mxu0 }
 0x147   :  { %v1096_v50 = vpack.c.bf16 %v969_v49, %v969_v49  ;;  %863 = vst.msk [vmem:[%s2555_s5 + $0xd8] sm:$0xf] %vm479_vm1, %v799_v48  ;;  %v438_v35 = vpack.c.bf16 %v312_v51, %v312_v51  ;;  %v642_v52 = vpop.f32.mrf.mxu1  ;;  %v67_v49 = vld [vmem:[%s2553_s0 + $0x170] sm:$0xff] }
 0x148   :  { %v768_v54 = vpack.c.bf16 %v642_v52, %v642_v52 }
 0x149   :  { %1161 = vst.msk [vmem:[%s2556_s6 + $0x58] sm:$0xf] %vm1138_vm2, %v1096_v50  ;;  %v68_v50 = vld [vmem:[%s2553_s0 + $0x178] sm:$0xff] }
 0x14a   :  { %503 = vst.msk [vmem:[%s2554_s4 + $0x5c] sm:$0xf] %vm479_vm1, %v438_v35 }
 0x14b   :  { %832 = vst.msk [vmem:[%s2555_s5 + $0x5c] sm:$0xf] %vm479_vm1, %v768_v54  ;;  %v108_v54 = vpack.c.bf16 %v68_v50, %v67_v49 }
 0x14c   :  { %v722_v56 = vpop.f32.mrf.mxu3 }
 0x14d   :  { %v800_v57 = vpack.c.bf16 %v722_v56, %v722_v56 }
 0x14e   :  { %v971_v58 = vpop.f32.mrf.mxu2  ;;  %v315_v62 = vpop.f32.mrf.mxu0 }
 0x14f   :  { %v1097_v61 = vpack.c.bf16 %v971_v58, %v971_v58  ;;  %864 = vst.msk [vmem:[%s2555_s5 + $0xdc] sm:$0xf] %vm479_vm1, %v800_v57  ;;  %v439_v63 = vpack.c.bf16 %v315_v62, %v315_v62  ;;  %v645_v0 = vpop.f32.mrf.mxu1 }
 0x150   :  { %v769_v1 = vpack.c.bf16 %v645_v0, %v645_v0 }
 0x151   :  { %1162 = vst.msk [vmem:[%s2556_s6 + $0x5c] sm:$0xf] %vm1138_vm2, %v1097_v61  ;;  %1251 = vmatmul.msk.bf16.gmra.mxu0 %vm149_vm0, %v105_v60  ;;  %1355 = vmatmul.msk.bf16.gmra.mxu3 %vm149_vm0, %v1542_v41 }
 0x152   :  { %504 = vst.msk [vmem:[%s2554_s4 + $0x60] sm:$0xf] %vm479_vm1, %v439_v63  ;;  %1299 = vmatmul.msk.bf16.gmra.mxu1 %vm149_vm0, %v105_v60 }
 0x153   :  { %833 = vst.msk [vmem:[%s2555_s5 + $0x60] sm:$0xf] %vm479_vm1, %v769_v1  ;;  %1347 = vmatmul.msk.bf16.gmra.mxu2 %vm149_vm0, %v105_v60 }
 0x154   :  { %v725_v2 = vpop.f32.mrf.mxu3 }
 0x155   :  { %v801_v3 = vpack.c.bf16 %v725_v2, %v725_v2 }
 0x156   :  { %v974_v4 = vpop.f32.mrf.mxu2  ;;  %v317_v6 = vpop.f32.mrf.mxu0 }
 0x157   :  { %v1098_v5 = vpack.c.bf16 %v974_v4, %v974_v4  ;;  %865 = vst.msk [vmem:[%s2555_s5 + $0xe0] sm:$0xf] %vm479_vm1, %v801_v3  ;;  %v440_v41 = vpack.c.bf16 %v317_v6, %v317_v6  ;;  %v647_v7 = vpop.f32.mrf.mxu1 }
 0x158   :  { %v770_v8 = vpack.c.bf16 %v647_v7, %v647_v7 }
 0x159   :  { %1163 = vst.msk [vmem:[%s2556_s6 + $0x60] sm:$0xf] %vm1138_vm2, %v1098_v5 }
 0x15a   :  { %505 = vst.msk [vmem:[%s2554_s4 + $0x64] sm:$0xf] %vm479_vm1, %v440_v41 }
 0x15b   :  { %834 = vst.msk [vmem:[%s2555_s5 + $0x64] sm:$0xf] %vm479_vm1, %v770_v8 }
 0x15c   :  { %v727_v10 = vpop.f32.mrf.mxu3 }
 0x15d   :  { %v802_v11 = vpack.c.bf16 %v727_v10, %v727_v10 }
 0x15e   :  { %v976_v12 = vpop.f32.mrf.mxu2  ;;  %v320_v15 = vpop.f32.mrf.mxu0 }
 0x15f   :  { %v1099_v14 = vpack.c.bf16 %v976_v12, %v976_v12  ;;  %866 = vst.msk [vmem:[%s2555_s5 + $0xe4] sm:$0xf] %vm479_vm1, %v802_v11  ;;  %v441_v16 = vpack.c.bf16 %v320_v15, %v320_v15  ;;  %v650_v18 = vpop.f32.mrf.mxu1 }
 0x160   :  { %v771_v19 = vpack.c.bf16 %v650_v18, %v650_v18 }
 0x161   :  { %1164 = vst.msk [vmem:[%s2556_s6 + $0x64] sm:$0xf] %vm1138_vm2, %v1099_v14  ;;  %1252 = vmatmul.msk.bf16.gmra.mxu0 %vm149_vm0, %v106_v13  ;;  %1356 = vmatmul.msk.bf16.gmra.mxu3 %vm149_vm0, %v1561_v47 }
 0x162   :  { %506 = vst.msk [vmem:[%s2554_s4 + $0x68] sm:$0xf] %vm479_vm1, %v441_v16  ;;  %1300 = vmatmul.msk.bf16.gmra.mxu1 %vm149_vm0, %v106_v13 }
 0x163   :  { %835 = vst.msk [vmem:[%s2555_s5 + $0x68] sm:$0xf] %vm479_vm1, %v771_v19  ;;  %1348 = vmatmul.msk.bf16.gmra.mxu2 %vm149_vm0, %v106_v13 }
 0x164   :  { %v730_v20 = vpop.f32.mrf.mxu3 }
 0x165   :  { %v803_v21 = vpack.c.bf16 %v730_v20, %v730_v20 }
 0x166   :  { %v979_v22 = vpop.f32.mrf.mxu2  ;;  %v322_v25 = vpop.f32.mrf.mxu0 }
 0x167   :  { %v1100_v24 = vpack.c.bf16 %v979_v22, %v979_v22  ;;  %867 = vst.msk [vmem:[%s2555_s5 + $0xe8] sm:$0xf] %vm479_vm1, %v803_v21  ;;  %v442_v47 = vpack.c.bf16 %v322_v25, %v322_v25  ;;  %v652_v26 = vpop.f32.mrf.mxu1 }
 0x168   :  { %v772_v27 = vpack.c.bf16 %v652_v26, %v652_v26 }
 0x169   :  { %1165 = vst.msk [vmem:[%s2556_s6 + $0x68] sm:$0xf] %vm1138_vm2, %v1100_v24 }
 0x16a   :  { %507 = vst.msk [vmem:[%s2554_s4 + $0x6c] sm:$0xf] %vm479_vm1, %v442_v47 }
 0x16b   :  { %836 = vst.msk [vmem:[%s2555_s5 + $0x6c] sm:$0xf] %vm479_vm1, %v772_v27 }
 0x16c   :  { %v732_v29 = vpop.f32.mrf.mxu3 }
 0x16d   :  { %v804_v31 = vpack.c.bf16 %v732_v29, %v732_v29 }
 0x16e   :  { %v981_v32 = vpop.f32.mrf.mxu2  ;;  %v325_v36 = vpop.f32.mrf.mxu0 }
 0x16f   :  { %v1101_v34 = vpack.c.bf16 %v981_v32, %v981_v32  ;;  %868 = vst.msk [vmem:[%s2555_s5 + $0xec] sm:$0xf] %vm479_vm1, %v804_v31  ;;  %v443_v37 = vpack.c.bf16 %v325_v36, %v325_v36  ;;  %v655_v38 = vpop.f32.mrf.mxu1 }
 0x170   :  { %v773_v39 = vpack.c.bf16 %v655_v38, %v655_v38 }
 0x171   :  { %1166 = vst.msk [vmem:[%s2556_s6 + $0x6c] sm:$0xf] %vm1138_vm2, %v1101_v34  ;;  %1253 = vmatmul.msk.bf16.gmra.mxu0 %vm149_vm0, %v107_v33  ;;  %1357 = vmatmul.msk.bf16.gmra.mxu3 %vm149_vm0, %v1580_v53 }
 0x172   :  { %508 = vst.msk [vmem:[%s2554_s4 + $0x70] sm:$0xf] %vm479_vm1, %v443_v37  ;;  %1301 = vmatmul.msk.bf16.gmra.mxu1 %vm149_vm0, %v107_v33 }
 0x173   :  { %837 = vst.msk [vmem:[%s2555_s5 + $0x70] sm:$0xf] %vm479_vm1, %v773_v39  ;;  %1349 = vmatmul.msk.bf16.gmra.mxu2 %vm149_vm0, %v107_v33 }
 0x174   :  { %v735_v40 = vpop.f32.mrf.mxu3 }
 0x175   :  { %v805_v42 = vpack.c.bf16 %v735_v40, %v735_v40 }
 0x176   :  { %v984_v43 = vpop.f32.mrf.mxu2  ;;  %v327_v45 = vpop.f32.mrf.mxu0 }
 0x177   :  { %v1102_v44 = vpack.c.bf16 %v984_v43, %v984_v43  ;;  %869 = vst.msk [vmem:[%s2555_s5 + $0xf0] sm:$0xf] %vm479_vm1, %v805_v42  ;;  %v444_v53 = vpack.c.bf16 %v327_v45, %v327_v45  ;;  %v657_v46 = vpop.f32.mrf.mxu1 }
 0x178   :  { %v774_v48 = vpack.c.bf16 %v657_v46, %v657_v46 }
 0x179   :  { %1167 = vst.msk [vmem:[%s2556_s6 + $0x70] sm:$0xf] %vm1138_vm2, %v1102_v44 }
 0x17a   :  { %509 = vst.msk [vmem:[%s2554_s4 + $0x74] sm:$0xf] %vm479_vm1, %v444_v53 }
 0x17b   :  { %838 = vst.msk [vmem:[%s2555_s5 + $0x74] sm:$0xf] %vm479_vm1, %v774_v48 }
 0x17c   :  { %v737_v51 = vpop.f32.mrf.mxu3 }
 0x17d   :  { %v806_v35 = vpack.c.bf16 %v737_v51, %v737_v51 }
 0x17e   :  { %v986_v52 = vpop.f32.mrf.mxu2  ;;  %v330_v55 = vpop.f32.mrf.mxu0 }
 0x17f   :  { %v1103_v17 = vpack.c.bf16 %v986_v52, %v986_v52  ;;  %870 = vst.msk [vmem:[%s2555_s5 + $0xf4] sm:$0xf] %vm479_vm1, %v806_v35  ;;  %v445_v56 = vpack.c.bf16 %v330_v55, %v330_v55  ;;  %v660_v57 = vpop.f32.mrf.mxu1 }
 0x180   :  { %v775_v58 = vpack.c.bf16 %v660_v57, %v660_v57 }
 0x181   :  { %1168 = vst.msk [vmem:[%s2556_s6 + $0x74] sm:$0xf] %vm1138_vm2, %v1103_v17  ;;  %1254 = vmatmul.msk.bf16.gmra.mxu0 %vm149_vm0, %v108_v54  ;;  %1358 = vmatmul.msk.bf16.gmra.mxu3 %vm149_vm0, %v1599_v59 }
 0x182   :  { %510 = vst.msk [vmem:[%s2554_s4 + $0x78] sm:$0xf] %vm479_vm1, %v445_v56  ;;  %1302 = vmatmul.msk.bf16.gmra.mxu1 %vm149_vm0, %v108_v54 }
 0x183   :  { %839 = vst.msk [vmem:[%s2555_s5 + $0x78] sm:$0xf] %vm479_vm1, %v775_v58  ;;  %1350 = vmatmul.msk.bf16.gmra.mxu2 %vm149_vm0, %v108_v54 }
 0x184   :  { %v740_v60 = vpop.f32.mrf.mxu3 }
 0x185   :  { %v807_v61 = vpack.c.bf16 %v740_v60, %v740_v60 }
 0x186   :  { %v989_v62 = vpop.f32.mrf.mxu2  ;;  %v332_v0 = vpop.f32.mrf.mxu0 }
 0x187   :  { %v1104_v63 = vpack.c.bf16 %v989_v62, %v989_v62  ;;  %871 = vst.msk [vmem:[%s2555_s5 + $0xf8] sm:$0xf] %vm479_vm1, %v807_v61  ;;  %v446_v59 = vpack.c.bf16 %v332_v0, %v332_v0  ;;  %v662_v1 = vpop.f32.mrf.mxu1 }
 0x188   :  { %v776_v2 = vpack.c.bf16 %v662_v1, %v662_v1 }
 0x189   :  { %1169 = vst.msk [vmem:[%s2556_s6 + $0x78] sm:$0xf] %vm1138_vm2, %v1104_v63 }
 0x18a   :  { %511 = vst.msk [vmem:[%s2554_s4 + $0x7c] sm:$0xf] %vm479_vm1, %v446_v59 }
 0x18b   :  { %840 = vst.msk [vmem:[%s2555_s5 + $0x7c] sm:$0xf] %vm479_vm1, %v776_v2 }
 0x18c   :  { %v742_v3 = vpop.f32.mrf.mxu3 }
 0x18d   :  { %v808_v4 = vpack.c.bf16 %v742_v3, %v742_v3 }
 0x18e   :  { %v991_v5 = vpop.f32.mrf.mxu2  ;;  %v335_v41 = vpop.f32.mrf.mxu0 }
 0x18f   :  { %v1105_v6 = vpack.c.bf16 %v991_v5, %v991_v5  ;;  %872 = vst.msk [vmem:[%s2555_s5 + $0xfc] sm:$0xf] %vm479_vm1, %v808_v4  ;;  %v447_v7 = vpack.c.bf16 %v335_v41, %v335_v41  ;;  %v665_v8 = vpop.f32.mrf.mxu1 }
 0x190   :  { %v777_v9 = vpack.c.bf16 %v665_v8, %v665_v8 }
 0x191   :  { %1170 = vst.msk [vmem:[%s2556_s6 + $0x7c] sm:$0xf] %vm1138_vm2, %v1105_v6 }
 0x192   :  { %512 = vst.msk [vmem:[%s2554_s4 + $0x80] sm:$0xf] %vm479_vm1, %v447_v7 }
 0x193   :  { %841 = vst.msk [vmem:[%s2555_s5 + $0x80] sm:$0xf] %vm479_vm1, %v777_v9 }
 0x194   :  { %v1034_v23 = vpop.f32.mrf.mxu3 }
 0x195   :  { %v1122_v11 = vpack.c.bf16 %v1034_v23, %v1034_v23 }
 0x196   :  { %v994_v10 = vpop.f32.mrf.mxu2  ;;  %v337_v13 = vpop.f32.mrf.mxu0 }
 0x197   :  { %v1106_v12 = vpack.c.bf16 %v994_v10, %v994_v10  ;;  %1187 = vst.msk [vmem:[%s2556_s6 + $0xc0] sm:$0xf] %vm1138_vm2, %v1122_v11  ;;  %v448_v14 = vpack.c.bf16 %v337_v13, %v337_v13  ;;  %v667_v15 = vpop.f32.mrf.mxu1 }
 0x198   :  { %v778_v16 = vpack.c.bf16 %v667_v15, %v667_v15 }
 0x199   :  { %1171 = vst.msk [vmem:[%s2556_s6 + $0x80] sm:$0xf] %vm1138_vm2, %v1106_v12 }
 0x19a   :  { %513 = vst.msk [vmem:[%s2554_s4 + $0x84] sm:$0xf] %vm479_vm1, %v448_v14 }
 0x19b   :  { %842 = vst.msk [vmem:[%s2555_s5 + $0x84] sm:$0xf] %vm479_vm1, %v778_v16 }
 0x19c   :  { %v1036_v18 = vpop.f32.mrf.mxu3 }
 0x19d   :  { %v1123_v20 = vpack.c.bf16 %v1036_v18, %v1036_v18 }
 0x19e   :  { %v996_v19 = vpop.f32.mrf.mxu2  ;;  %v340_v22 = vpop.f32.mrf.mxu0 }
 0x19f   :  { %v1107_v21 = vpack.c.bf16 %v996_v19, %v996_v19  ;;  %1188 = vst.msk [vmem:[%s2556_s6 + $0xc4] sm:$0xf] %vm1138_vm2, %v1123_v20  ;;  %v449_v24 = vpack.c.bf16 %v340_v22, %v340_v22  ;;  %v670_v25 = vpop.f32.mrf.mxu1 }
 0x1a0   :  { %v779_v47 = vpack.c.bf16 %v670_v25, %v670_v25 }
 0x1a1   :  { %1172 = vst.msk [vmem:[%s2556_s6 + $0x84] sm:$0xf] %vm1138_vm2, %v1107_v21 }
 0x1a2   :  { %514 = vst.msk [vmem:[%s2554_s4 + $0x88] sm:$0xf] %vm479_vm1, %v449_v24 }
 0x1a3   :  { %843 = vst.msk [vmem:[%s2555_s5 + $0x88] sm:$0xf] %vm479_vm1, %v779_v47 }
 0x1a4   :  { %v1039_v26 = vpop.f32.mrf.mxu3 }
 0x1a5   :  { %v1124_v28 = vpack.c.bf16 %v1039_v26, %v1039_v26 }
 0x1a6   :  { %v999_v27 = vpop.f32.mrf.mxu2  ;;  %v342_v29 = vpop.f32.mrf.mxu0 }
 0x1a7   :  { %v1108_v30 = vpack.c.bf16 %v999_v27, %v999_v27  ;;  %1189 = vst.msk [vmem:[%s2556_s6 + $0xc8] sm:$0xf] %vm1138_vm2, %v1124_v28  ;;  %v450_v31 = vpack.c.bf16 %v342_v29, %v342_v29  ;;  %v672_v32 = vpop.f32.mrf.mxu1 }
 0x1a8   :  { %v780_v33 = vpack.c.bf16 %v672_v32, %v672_v32 }
 0x1a9   :  { %1173 = vst.msk [vmem:[%s2556_s6 + $0x88] sm:$0xf] %vm1138_vm2, %v1108_v30 }
 0x1aa   :  { %515 = vst.msk [vmem:[%s2554_s4 + $0x8c] sm:$0xf] %vm479_vm1, %v450_v31 }
 0x1ab   :  { %844 = vst.msk [vmem:[%s2555_s5 + $0x8c] sm:$0xf] %vm479_vm1, %v780_v33 }
 0x1ac   :  { %v1041_v34 = vpop.f32.mrf.mxu3 }
 0x1ad   :  { %v1125_v37 = vpack.c.bf16 %v1041_v34, %v1041_v34 }
 0x1ae   :  { %v1001_v36 = vpop.f32.mrf.mxu2  ;;  %v345_v39 = vpop.f32.mrf.mxu0 }
 0x1af   :  { %v1109_v38 = vpack.c.bf16 %v1001_v36, %v1001_v36  ;;  %1190 = vst.msk [vmem:[%s2556_s6 + $0xcc] sm:$0xf] %vm1138_vm2, %v1125_v37  ;;  %v451_v40 = vpack.c.bf16 %v345_v39, %v345_v39  ;;  %v675_v42 = vpop.f32.mrf.mxu1 }
 0x1b0   :  { %v781_v43 = vpack.c.bf16 %v675_v42, %v675_v42 }
 0x1b1   :  { %1174 = vst.msk [vmem:[%s2556_s6 + $0x8c] sm:$0xf] %vm1138_vm2, %v1109_v38 }
 0x1b2   :  { %516 = vst.msk [vmem:[%s2554_s4 + $0x90] sm:$0xf] %vm479_vm1, %v451_v40 }
 0x1b3   :  { %845 = vst.msk [vmem:[%s2555_s5 + $0x90] sm:$0xf] %vm479_vm1, %v781_v43 }
 0x1b4   :  { %v1044_v44 = vpop.f32.mrf.mxu3 }
 0x1b5   :  { %v1126_v53 = vpack.c.bf16 %v1044_v44, %v1044_v44 }
 0x1b6   :  { %v1004_v45 = vpop.f32.mrf.mxu2  ;;  %v347_v48 = vpop.f32.mrf.mxu0 }
 0x1b7   :  { %v1110_v46 = vpack.c.bf16 %v1004_v45, %v1004_v45  ;;  %1191 = vst.msk [vmem:[%s2556_s6 + $0xd0] sm:$0xf] %vm1138_vm2, %v1126_v53  ;;  %v452_v49 = vpack.c.bf16 %v347_v48, %v347_v48  ;;  %v677_v50 = vpop.f32.mrf.mxu1 }
 0x1b8   :  { %v782_v51 = vpack.c.bf16 %v677_v50, %v677_v50 }
 0x1b9   :  { %1175 = vst.msk [vmem:[%s2556_s6 + $0x90] sm:$0xf] %vm1138_vm2, %v1110_v46 }
 0x1ba   :  { %517 = vst.msk [vmem:[%s2554_s4 + $0x94] sm:$0xf] %vm479_vm1, %v452_v49 }
 0x1bb   :  { %846 = vst.msk [vmem:[%s2555_s5 + $0x94] sm:$0xf] %vm479_vm1, %v782_v51 }
 0x1bc   :  { %v1046_v35 = vpop.f32.mrf.mxu3 }
 0x1bd   :  { %v1127_v54 = vpack.c.bf16 %v1046_v35, %v1046_v35 }
 0x1be   :  { %v1006_v52 = vpop.f32.mrf.mxu2  ;;  %v350_v55 = vpop.f32.mrf.mxu0 }
 0x1bf   :  { %v1111_v17 = vpack.c.bf16 %v1006_v52, %v1006_v52  ;;  %1192 = vst.msk [vmem:[%s2556_s6 + $0xd4] sm:$0xf] %vm1138_vm2, %v1127_v54  ;;  %v453_v56 = vpack.c.bf16 %v350_v55, %v350_v55  ;;  %v680_v57 = vpop.f32.mrf.mxu1 }
 0x1c0   :  { %v783_v58 = vpack.c.bf16 %v680_v57, %v680_v57 }
 0x1c1   :  { %1176 = vst.msk [vmem:[%s2556_s6 + $0x94] sm:$0xf] %vm1138_vm2, %v1111_v17 }
 0x1c2   :  { %518 = vst.msk [vmem:[%s2554_s4 + $0x98] sm:$0xf] %vm479_vm1, %v453_v56 }
 0x1c3   :  { %847 = vst.msk [vmem:[%s2555_s5 + $0x98] sm:$0xf] %vm479_vm1, %v783_v58 }
 0x1c4   :  { %v1049_v60 = vpop.f32.mrf.mxu3 }
 0x1c5   :  { %v1128_v62 = vpack.c.bf16 %v1049_v60, %v1049_v60 }
 0x1c6   :  { %v1009_v61 = vpop.f32.mrf.mxu2  ;;  %v352_v0 = vpop.f32.mrf.mxu0 }
 0x1c7   :  { %v1112_v63 = vpack.c.bf16 %v1009_v61, %v1009_v61  ;;  %1193 = vst.msk [vmem:[%s2556_s6 + $0xd8] sm:$0xf] %vm1138_vm2, %v1128_v62  ;;  %v454_v59 = vpack.c.bf16 %v352_v0, %v352_v0  ;;  %v682_v1 = vpop.f32.mrf.mxu1 }
 0x1c8   :  { %v784_v2 = vpack.c.bf16 %v682_v1, %v682_v1 }
 0x1c9   :  { %1177 = vst.msk [vmem:[%s2556_s6 + $0x98] sm:$0xf] %vm1138_vm2, %v1112_v63 }
 0x1ca   :  { %519 = vst.msk [vmem:[%s2554_s4 + $0x9c] sm:$0xf] %vm479_vm1, %v454_v59 }
 0x1cb   :  { %848 = vst.msk [vmem:[%s2555_s5 + $0x9c] sm:$0xf] %vm479_vm1, %v784_v2 }
 0x1cc   :  { %v1051_v3 = vpop.f32.mrf.mxu3 }
 0x1cd   :  { %v1129_v5 = vpack.c.bf16 %v1051_v3, %v1051_v3 }
 0x1ce   :  { %v1011_v4 = vpop.f32.mrf.mxu2  ;;  %v355_v41 = vpop.f32.mrf.mxu0 }
 0x1cf   :  { %v1113_v6 = vpack.c.bf16 %v1011_v4, %v1011_v4  ;;  %1194 = vst.msk [vmem:[%s2556_s6 + $0xdc] sm:$0xf] %vm1138_vm2, %v1129_v5  ;;  %v455_v7 = vpack.c.bf16 %v355_v41, %v355_v41  ;;  %v685_v8 = vpop.f32.mrf.mxu1 }
 0x1d0   :  { %v785_v9 = vpack.c.bf16 %v685_v8, %v685_v8 }
 0x1d1   :  { %1178 = vst.msk [vmem:[%s2556_s6 + $0x9c] sm:$0xf] %vm1138_vm2, %v1113_v6 }
 0x1d2   :  { %520 = vst.msk [vmem:[%s2554_s4 + $0xa0] sm:$0xf] %vm479_vm1, %v455_v7 }
 0x1d3   :  { %849 = vst.msk [vmem:[%s2555_s5 + $0xa0] sm:$0xf] %vm479_vm1, %v785_v9 }
 0x1d4   :  { %v1054_v23 = vpop.f32.mrf.mxu3 }
 0x1d5   :  { %v1130_v11 = vpack.c.bf16 %v1054_v23, %v1054_v23 }
 0x1d6   :  { %v1014_v10 = vpop.f32.mrf.mxu2  ;;  %v357_v13 = vpop.f32.mrf.mxu0 }
 0x1d7   :  { %v1114_v12 = vpack.c.bf16 %v1014_v10, %v1014_v10  ;;  %1195 = vst.msk [vmem:[%s2556_s6 + $0xe0] sm:$0xf] %vm1138_vm2, %v1130_v11  ;;  %v456_v14 = vpack.c.bf16 %v357_v13, %v357_v13  ;;  %v687_v15 = vpop.f32.mrf.mxu1 }
 0x1d8   :  { %v786_v16 = vpack.c.bf16 %v687_v15, %v687_v15 }
 0x1d9   :  { %1179 = vst.msk [vmem:[%s2556_s6 + $0xa0] sm:$0xf] %vm1138_vm2, %v1114_v12 }
 0x1da   :  { %521 = vst.msk [vmem:[%s2554_s4 + $0xa4] sm:$0xf] %vm479_vm1, %v456_v14 }
 0x1db   :  { %850 = vst.msk [vmem:[%s2555_s5 + $0xa4] sm:$0xf] %vm479_vm1, %v786_v16 }
 0x1dc   :  { %v1056_v18 = vpop.f32.mrf.mxu3 }
 0x1dd   :  { %v1131_v20 = vpack.c.bf16 %v1056_v18, %v1056_v18 }
 0x1de   :  { %v1016_v19 = vpop.f32.mrf.mxu2  ;;  %v360_v22 = vpop.f32.mrf.mxu0 }
 0x1df   :  { %v1115_v21 = vpack.c.bf16 %v1016_v19, %v1016_v19  ;;  %1196 = vst.msk [vmem:[%s2556_s6 + $0xe4] sm:$0xf] %vm1138_vm2, %v1131_v20  ;;  %v457_v24 = vpack.c.bf16 %v360_v22, %v360_v22  ;;  %v690_v25 = vpop.f32.mrf.mxu1 }
 0x1e0   :  { %v787_v47 = vpack.c.bf16 %v690_v25, %v690_v25 }
 0x1e1   :  { %1180 = vst.msk [vmem:[%s2556_s6 + $0xa4] sm:$0xf] %vm1138_vm2, %v1115_v21 }
 0x1e2   :  { %522 = vst.msk [vmem:[%s2554_s4 + $0xa8] sm:$0xf] %vm479_vm1, %v457_v24 }
 0x1e3   :  { %851 = vst.msk [vmem:[%s2555_s5 + $0xa8] sm:$0xf] %vm479_vm1, %v787_v47 }
 0x1e4   :  { %v1059_v26 = vpop.f32.mrf.mxu3 }
 0x1e5   :  { %v1132_v28 = vpack.c.bf16 %v1059_v26, %v1059_v26 }
 0x1e6   :  { %v1019_v27 = vpop.f32.mrf.mxu2  ;;  %v362_v29 = vpop.f32.mrf.mxu0 }
 0x1e7   :  { %v1116_v30 = vpack.c.bf16 %v1019_v27, %v1019_v27  ;;  %1197 = vst.msk [vmem:[%s2556_s6 + $0xe8] sm:$0xf] %vm1138_vm2, %v1132_v28  ;;  %v458_v31 = vpack.c.bf16 %v362_v29, %v362_v29  ;;  %v692_v32 = vpop.f32.mrf.mxu1 }
 0x1e8   :  { %v788_v33 = vpack.c.bf16 %v692_v32, %v692_v32 }
 0x1e9   :  { %1181 = vst.msk [vmem:[%s2556_s6 + $0xa8] sm:$0xf] %vm1138_vm2, %v1116_v30 }
 0x1ea   :  { %523 = vst.msk [vmem:[%s2554_s4 + $0xac] sm:$0xf] %vm479_vm1, %v458_v31 }
 0x1eb   :  { %852 = vst.msk [vmem:[%s2555_s5 + $0xac] sm:$0xf] %vm479_vm1, %v788_v33 }
 0x1ec   :  { %v1061_v34 = vpop.f32.mrf.mxu3 }
 0x1ed   :  { %v1133_v37 = vpack.c.bf16 %v1061_v34, %v1061_v34 }
 0x1ee   :  { %v1021_v36 = vpop.f32.mrf.mxu2  ;;  %v365_v39 = vpop.f32.mrf.mxu0 }
 0x1ef   :  { %v1117_v38 = vpack.c.bf16 %v1021_v36, %v1021_v36  ;;  %1198 = vst.msk [vmem:[%s2556_s6 + $0xec] sm:$0xf] %vm1138_vm2, %v1133_v37  ;;  %v459_v40 = vpack.c.bf16 %v365_v39, %v365_v39  ;;  %v695_v42 = vpop.f32.mrf.mxu1 }
 0x1f0   :  { %v789_v43 = vpack.c.bf16 %v695_v42, %v695_v42 }
 0x1f1   :  { %1182 = vst.msk [vmem:[%s2556_s6 + $0xac] sm:$0xf] %vm1138_vm2, %v1117_v38 }
 0x1f2   :  { %524 = vst.msk [vmem:[%s2554_s4 + $0xb0] sm:$0xf] %vm479_vm1, %v459_v40 }
 0x1f3   :  { %853 = vst.msk [vmem:[%s2555_s5 + $0xb0] sm:$0xf] %vm479_vm1, %v789_v43 }
 0x1f4   :  { %v1064_v44 = vpop.f32.mrf.mxu3 }
 0x1f5   :  { %v1134_v53 = vpack.c.bf16 %v1064_v44, %v1064_v44 }
 0x1f6   :  { %v1024_v45 = vpop.f32.mrf.mxu2  ;;  %v367_v48 = vpop.f32.mrf.mxu0 }
 0x1f7   :  { %v1118_v46 = vpack.c.bf16 %v1024_v45, %v1024_v45  ;;  %1199 = vst.msk [vmem:[%s2556_s6 + $0xf0] sm:$0xf] %vm1138_vm2, %v1134_v53  ;;  %v460_v49 = vpack.c.bf16 %v367_v48, %v367_v48  ;;  %v697_v50 = vpop.f32.mrf.mxu1 }
 0x1f8   :  { %v790_v51 = vpack.c.bf16 %v697_v50, %v697_v50 }
 0x1f9   :  { %1183 = vst.msk [vmem:[%s2556_s6 + $0xb0] sm:$0xf] %vm1138_vm2, %v1118_v46 }
 0x1fa   :  { %525 = vst.msk [vmem:[%s2554_s4 + $0xb4] sm:$0xf] %vm479_vm1, %v460_v49 }
 0x1fb   :  { %854 = vst.msk [vmem:[%s2555_s5 + $0xb4] sm:$0xf] %vm479_vm1, %v790_v51 }
 0x1fc   :  { %v1066_v35 = vpop.f32.mrf.mxu3 }
 0x1fd   :  { %v1135_v54 = vpack.c.bf16 %v1066_v35, %v1066_v35 }
 0x1fe   :  { %v1026_v52 = vpop.f32.mrf.mxu2  ;;  %v370_v55 = vpop.f32.mrf.mxu0 }
 0x1ff   :  { %v1119_v17 = vpack.c.bf16 %v1026_v52, %v1026_v52  ;;  %1200 = vst.msk [vmem:[%s2556_s6 + $0xf4] sm:$0xf] %vm1138_vm2, %v1135_v54  ;;  %v461_v56 = vpack.c.bf16 %v370_v55, %v370_v55  ;;  %v700_v57 = vpop.f32.mrf.mxu1 }
 0x200   :  { %v791_v58 = vpack.c.bf16 %v700_v57, %v700_v57 }
 0x201   :  { %1184 = vst.msk [vmem:[%s2556_s6 + $0xb4] sm:$0xf] %vm1138_vm2, %v1119_v17 }
 0x202   :  { %526 = vst.msk [vmem:[%s2554_s4 + $0xb8] sm:$0xf] %vm479_vm1, %v461_v56 }
 0x203   :  { %855 = vst.msk [vmem:[%s2555_s5 + $0xb8] sm:$0xf] %vm479_vm1, %v791_v58 }
 0x204   :  { %v1069_v60 = vpop.f32.mrf.mxu3 }
 0x205   :  { %v1136_v62 = vpack.c.bf16 %v1069_v60, %v1069_v60 }
 0x206   :  { %v1029_v61 = vpop.f32.mrf.mxu2  ;;  %v372_v0 = vpop.f32.mrf.mxu0 }
 0x207   :  { %v1120_v63 = vpack.c.bf16 %v1029_v61, %v1029_v61  ;;  %1201 = vst.msk [vmem:[%s2556_s6 + $0xf8] sm:$0xf] %vm1138_vm2, %v1136_v62  ;;  %v462_v59 = vpack.c.bf16 %v372_v0, %v372_v0  ;;  %v702_v1 = vpop.f32.mrf.mxu1 }
 0x208   :  { %v792_v2 = vpack.c.bf16 %v702_v1, %v702_v1 }
 0x209   :  { %1185 = vst.msk [vmem:[%s2556_s6 + $0xb8] sm:$0xf] %vm1138_vm2, %v1120_v63 }
 0x20a   :  { %527 = vst.msk [vmem:[%s2554_s4 + $0xbc] sm:$0xf] %vm479_vm1, %v462_v59 }
 0x20b   :  { %856 = vst.msk [vmem:[%s2555_s5 + $0xbc] sm:$0xf] %vm479_vm1, %v792_v2 }
 0x20c   :  { %v1071_v3 = vpop.f32.mrf.mxu3 }
 0x20d   :  { %v1137_v5 = vpack.c.bf16 %v1071_v3, %v1071_v3 }
 0x20e   :  { %v1031_v4 = vpop.f32.mrf.mxu2 }
 0x20f   :  { %v1121_v6 = vpack.c.bf16 %v1031_v4, %v1031_v4  ;;  %1202 = vst.msk [vmem:[%s2556_s6 + $0xfc] sm:$0xf] %vm1138_vm2, %v1137_v5 }
 0x211   :  { %1186 = vst.msk [vmem:[%s2556_s6 + $0xbc] sm:$0xf] %vm1138_vm2, %v1121_v6 }

</bundles_post_ra>
